<compile_context>
chip_gen: v7x
topology: tpu7x:2x2x1
jax: 0.10.0
libtpu: 0.0.40
codegen_flags: <defaults>
</compile_context>

<pallas_src>
import functools
import math

import jax
import jax.numpy as jnp
from jax.experimental import pallas as pl
from jax.experimental.pallas import tpu as pltpu


def _layernorm(v, w, b, eps=1e-5):
    mu = jnp.mean(v, axis=-1, keepdims=True)
    var = jnp.mean((v - mu) ** 2, axis=-1, keepdims=True)
    return (v - mu) * jax.lax.rsqrt(var + eps) * w + b


# ----------------------------------------------------------------------------
# Fused transformer kernel: grid = (batch_blocks, layers).
# x lives in a VMEM scratch across the layer axis; weights are pipelined.
# ----------------------------------------------------------------------------
def resblock_kernel(x_ref,
                    ln1w_ref, ln1b_ref,
                    wq_ref, wk_ref, wv_ref, bq_ref, bk_ref, bv_ref,
                    wo_ref, bo_ref,
                    ln2w_ref, ln2b_ref,
                    wfc_ref, bfc_ref, wpr_ref, bpr_ref,
                    mask_ref,
                    o_ref,
                    x_sc, attn_sc,
                    *, num_heads):
    layer = pl.program_id(1)

    @pl.when(layer == 0)
    def _():
        x_sc[...] = x_ref[...]          # load activations once per batch block

    x = x_sc[...]                       # (Bt, L, W) f32, resident across layers
    Bt, L, W = x.shape
    dh = W // num_heads
    scale = 1.0 / math.sqrt(dh)         # PyTorch MHA scaling: head_dim**-0.5
    mask = mask_ref[...]                # (L, L) causal additive mask (f32)

    # ---- attention branch: x + out_proj(MHA(ln_1(x))) ----
    h = _layernorm(x, ln1w_ref[0], ln1b_ref[0])
    hb = h.astype(jnp.bfloat16).reshape(Bt * L, W)
    q = (jnp.dot(hb, wq_ref[0], preferred_element_type=jnp.float32)
         + bq_ref[0]).reshape(Bt, L, W)
    k = (jnp.dot(hb, wk_ref[0], preferred_element_type=jnp.float32)
         + bk_ref[0]).reshape(Bt, L, W)
    v = (jnp.dot(hb, wv_ref[0], preferred_element_type=jnp.float32)
         + bv_ref[0]).reshape(Bt, L, W)

    # Static per-head loop; each head's output goes straight into VMEM scratch
    # (no concat, no H live head arrays). Heads are batched over Bt via einsum.
    for hh in range(num_heads):
        sl = slice(hh * dh, (hh + 1) * dh)
        qh = q[:, :, sl].astype(jnp.bfloat16)
        kh = k[:, :, sl].astype(jnp.bfloat16)
        vh = v[:, :, sl].astype(jnp.bfloat16)
        s = jnp.einsum('bqd,bkd->bqk', qh, kh,
                       preferred_element_type=jnp.float32) * scale + mask
        s = s - jnp.max(s, axis=-1, keepdims=True)
        p = jnp.exp(s)
        p = p * pl.reciprocal(jnp.sum(p, axis=-1, keepdims=True), approx=True)
        attn_sc[:, :, sl] = jnp.einsum('bqk,bkd->bqd', p.astype(jnp.bfloat16),
                                       vh, preferred_element_type=jnp.float32)

    attn = (jnp.dot(attn_sc[...].astype(jnp.bfloat16).reshape(Bt * L, W),
                    wo_ref[0], preferred_element_type=jnp.float32)
            + bo_ref[0]).reshape(Bt, L, W)
    x = x + attn

    # ---- MLP branch: x + c_proj(quick_gelu(c_fc(ln_2(x)))) ----
    h2 = _layernorm(x, ln2w_ref[0], ln2b_ref[0])
    f = (jnp.dot(h2.astype(jnp.bfloat16).reshape(Bt * L, W), wfc_ref[0],
                 preferred_element_type=jnp.float32) + bfc_ref[0])
    f = f * jax.nn.sigmoid(1.702 * f)            # QuickGELU (kept in f32)
    f = (jnp.dot(f.astype(jnp.bfloat16), wpr_ref[0],
                 preferred_element_type=jnp.float32)
         + bpr_ref[0]).reshape(Bt, L, W)
    x = x + f

    x_sc[...] = x

    @pl.when(layer == pl.num_programs(1) - 1)
    def _():
        o_ref[...] = x_sc[...]           # single HBM writeback per batch block


def run_transformer(x, params, mask, num_heads, *, batch_block=None):
    B, L, W = x.shape
    layers = params['ln1_w'].shape[0]
    Bt = B if batch_block is None else batch_block
    assert B % Bt == 0
    kernel = functools.partial(resblock_kernel, num_heads=num_heads)

    def wspec(a):
        # One layer slice per grid step, double-buffered across the layer axis.
        shape = (1,) + a.shape[1:]
        nd = len(shape)
        return pl.BlockSpec(shape, lambda b, l, _nd=nd: (l,) + (0,) * (_nd - 1))

    weights = (params['ln1_w'], params['ln1_b'],
               params['wq'], params['wk'], params['wv'],
               params['bq'], params['bk'], params['bv'],
               params['wo'], params['bo'],
               params['ln2_w'], params['ln2_b'],
               params['wfc'], params['bfc'], params['wpr'], params['bpr'])

    in_specs = ([pl.BlockSpec((Bt, L, W), lambda b, l: (b, 0, 0))]
                + [wspec(w) for w in weights]
                + [pl.BlockSpec(mask.shape, lambda b, l: (0, 0))])

    return pl.pallas_call(
        kernel,
        out_shape=jax.ShapeDtypeStruct((B, L, W), jnp.float32),
        grid_spec=pltpu.PrefetchScalarGridSpec(
            num_scalar_prefetch=0,
            grid=(B // Bt, layers),
            in_specs=in_specs,
            out_specs=pl.BlockSpec((Bt, L, W), lambda b, l: (b, 0, 0)),
            scratch_shapes=[pltpu.VMEM((Bt, L, W), jnp.float32),   # resident x
                            pltpu.VMEM((Bt, L, W), jnp.float32)],  # attn heads
        ),
        compiler_params=pltpu.CompilerParams(
            dimension_semantics=("parallel", "arbitrary"),
            vmem_limit_bytes=64 * 1024 * 1024),
    )(x, *weights, mask)


# ----------------------------------------------------------------------------
# Final kernel: ln_final on the gathered EOT rows + projection to embed_dim.
# (ln_final is per-token, so applying it after selecting the EOT row is
# exactly equivalent to the PyTorch "ln then select" order.)
# ----------------------------------------------------------------------------
def final_kernel(x_ref, lnw_ref, lnb_ref, proj_ref, o_ref):
    row = _layernorm(x_ref[...], lnw_ref[...], lnb_ref[...])       # (B, W)
    o_ref[...] = jnp.dot(row, proj_ref[...], preferred_element_type=jnp.float32)


def run_final(x_eot, lnw, lnb, proj):
    B, W = x_eot.shape
    E = proj.shape[1]
    return pl.pallas_call(
        final_kernel,
        out_shape=jax.ShapeDtypeStruct((B, E), jnp.float32),
    )(x_eot, lnw, lnb, proj)


# ----------------------------------------------------------------------------
# Deterministic parameter init (same stds as TextModel.initialize_parameters).
# Per-layer weights are stacked on a leading `layers` axis; matmul weights are
# stored in bf16, biases / LayerNorm params in f32.
# ----------------------------------------------------------------------------
def init_params(key, *, embed_dim, context_length, vocab_size, width, layers):
    W = width
    proj_std = (W ** -0.5) * ((2 * layers) ** -0.5)
    attn_std = W ** -0.5
    fc_std = (2 * W) ** -0.5
    (k_tok, k_pos, k_proj, k_q, k_k, k_v, k_o, k_fc, k_pr) = jax.random.split(key, 9)

    def stacked(k, shape, std):
        w = std * jax.random.normal(k, (layers,) + shape, jnp.float32)
        return w.astype(jnp.bfloat16)

    return {
        'token_embedding': 0.02 * jax.random.normal(k_tok, (vocab_size, W), jnp.float32),
        'positional_embedding': 0.01 * jax.random.normal(k_pos, (context_length, W), jnp.float32),
        'ln_final_w': jnp.ones((1, W), jnp.float32),
        'ln_final_b': jnp.zeros((1, W), jnp.float32),
        'text_projection': attn_std * jax.random.normal(k_proj, (W, embed_dim), jnp.float32),
        'ln1_w': jnp.ones((layers, 1, W), jnp.float32),
        'ln1_b': jnp.zeros((layers, 1, W), jnp.float32),
        'wq': stacked(k_q, (W, W), attn_std),            # x @ Wq^T layout
        'wk': stacked(k_k, (W, W), attn_std),
        'wv': stacked(k_v, (W, W), attn_std),
        'bq': jnp.zeros((layers, 1, W), jnp.float32),
        'bk': jnp.zeros((layers, 1, W), jnp.float32),
        'bv': jnp.zeros((layers, 1, W), jnp.float32),
        'wo': stacked(k_o, (W, W), proj_std),
        'bo': jnp.zeros((layers, 1, W), jnp.float32),
        'ln2_w': jnp.ones((layers, 1, W), jnp.float32),
        'ln2_b': jnp.zeros((layers, 1, W), jnp.float32),
        'wfc': stacked(k_fc, (W, 4 * W), fc_std),
        'bfc': jnp.zeros((layers, 1, 4 * W), jnp.float32),
        'wpr': stacked(k_pr, (4 * W, W), proj_std),
        'bpr': jnp.zeros((layers, 1, W), jnp.float32),
    }


def build_attention_mask(L):
    r = jnp.arange(L)
    return jnp.where(r[None, :] > r[:, None], -jnp.inf, 0.0).astype(jnp.float32)


def text_model_forward(text, params, mask, num_heads):
    # TODO(synk): token-embedding gather, positional add and the EOT-row gather
    # are plain-JAX glue (data-dependent HBM gathers, not the matmul hot path).
    x = jnp.take(params['token_embedding'], text, axis=0)        # (B, L, W)
    x = x + params['positional_embedding'][None, :, :]
    x = run_transformer(x, params, mask, num_heads)
    eot = jnp.argmax(text, axis=-1)                              # EOT token index
    x_eot = x[jnp.arange(x.shape[0]), eot]                       # (B, W)
    return run_final(x_eot, params['ln_final_w'], params['ln_final_b'],
                     params['text_projection'])


if __name__ == "__main__":
    B = 2
    context_length = 8
    vocab_size = 64
    width = 32
    heads = 4
    layers = 2
    embed_dim = 16

    key = jax.random.PRNGKey(0)
    k_text, k_params = jax.random.split(key)
    text = jax.random.randint(k_text, (B, context_length), 0, vocab_size, dtype=jnp.int32)
    params = init_params(k_params, embed_dim=embed_dim, context_length=context_length,
                         vocab_size=vocab_size, width=width, layers=layers)
    mask = build_attention_mask(context_length)

    fwd = jax.jit(functools.partial(text_model_forward, num_heads=heads))
    out = fwd(text, params, mask)
    out = jax.block_until_ready(out)
    assert out.shape == (B, embed_dim)
    assert bool(jnp.all(jnp.isfinite(out)))
    print("KERNEL_OK")
</pallas_src>

<mosaic_0001>
module attributes {stable_mosaic.version = 11 : i64} {
  func.func @resblock_kernel(%arg0: i32, %arg1: i32, %arg2: memref<2x8x32xf32, #tpu.memory_space<vmem>>, %arg3: memref<1x1x32xf32, #tpu.memory_space<vmem>>, %arg4: memref<1x1x32xf32, #tpu.memory_space<vmem>>, %arg5: memref<1x32x32xbf16, #tpu.memory_space<vmem>>, %arg6: memref<1x32x32xbf16, #tpu.memory_space<vmem>>, %arg7: memref<1x32x32xbf16, #tpu.memory_space<vmem>>, %arg8: memref<1x1x32xf32, #tpu.memory_space<vmem>>, %arg9: memref<1x1x32xf32, #tpu.memory_space<vmem>>, %arg10: memref<1x1x32xf32, #tpu.memory_space<vmem>>, %arg11: memref<1x32x32xbf16, #tpu.memory_space<vmem>>, %arg12: memref<1x1x32xf32, #tpu.memory_space<vmem>>, %arg13: memref<1x1x32xf32, #tpu.memory_space<vmem>>, %arg14: memref<1x1x32xf32, #tpu.memory_space<vmem>>, %arg15: memref<1x32x128xbf16, #tpu.memory_space<vmem>>, %arg16: memref<1x1x128xf32, #tpu.memory_space<vmem>>, %arg17: memref<1x128x32xbf16, #tpu.memory_space<vmem>>, %arg18: memref<1x1x32xf32, #tpu.memory_space<vmem>>, %arg19: memref<8x8xf32, #tpu.memory_space<vmem>>, %arg20: memref<2x8x32xf32, #tpu.memory_space<vmem>>, %arg21: memref<2x8x32xf32, #tpu.memory_space<vmem>>, %arg22: memref<2x8x32xf32, #tpu.memory_space<vmem>>) attributes {dimension_semantics = [#tpu.dimension_semantics<parallel>, #tpu.dimension_semantics<arbitrary>], iteration_bounds = array<i64: 1, 2>, scalar_prefetch = 0 : i64, scratch_operands = 2 : i64, tpu.core_type = #tpu.core_type<tc>, window_params = [{transform_indices = @transform_0, window_bounds = array<i64: 2, 8, 32>}, {transform_indices = @transform_1, window_bounds = array<i64: 1, 1, 32>}, {transform_indices = @transform_2, window_bounds = array<i64: 1, 1, 32>}, {transform_indices = @transform_3, window_bounds = array<i64: 1, 32, 32>}, {transform_indices = @transform_4, window_bounds = array<i64: 1, 32, 32>}, {transform_indices = @transform_5, window_bounds = array<i64: 1, 32, 32>}, {transform_indices = @transform_6, window_bounds = array<i64: 1, 1, 32>}, {transform_indices = @transform_7, window_bounds = array<i64: 1, 1, 32>}, {transform_indices = @transform_8, window_bounds = array<i64: 1, 1, 32>}, {transform_indices = @transform_9, window_bounds = array<i64: 1, 32, 32>}, {transform_indices = @transform_10, window_bounds = array<i64: 1, 1, 32>}, {transform_indices = @transform_11, window_bounds = array<i64: 1, 1, 32>}, {transform_indices = @transform_12, window_bounds = array<i64: 1, 1, 32>}, {transform_indices = @transform_13, window_bounds = array<i64: 1, 32, 128>}, {transform_indices = @transform_14, window_bounds = array<i64: 1, 1, 128>}, {transform_indices = @transform_15, window_bounds = array<i64: 1, 128, 32>}, {transform_indices = @transform_16, window_bounds = array<i64: 1, 1, 32>}, {pipeline_mode = #tpu.pipeline_mode<synchronous>, transform_indices = @transform_17, window_bounds = array<i64: 8, 8>}, {transform_indices = @transform_18, window_bounds = array<i64: 2, 8, 32>}]} {
    %c0_i32 = arith.constant 0 : i32
    %0 = arith.cmpi eq, %arg1, %c0_i32 : i32
    %1 = arith.extui %0 : i1 to i32
    %c0_i32_0 = arith.constant 0 : i32
    %2 = arith.cmpi ne, %1, %c0_i32_0 : i32
    scf.if %2 {
      %c0_106 = arith.constant 0 : index
      %c0_107 = arith.constant 0 : index
      %c0_108 = arith.constant 0 : index
      %230 = vector.load %arg2[%c0_106, %c0_107, %c0_108] : memref<2x8x32xf32, #tpu.memory_space<vmem>>, vector<2x8x32xf32>
      %c0_109 = arith.constant 0 : index
      %c0_110 = arith.constant 0 : index
      %c0_111 = arith.constant 0 : index
      %231 = vector.load %arg21[%c0_109, %c0_110, %c0_111] : memref<2x8x32xf32, #tpu.memory_space<vmem>>, vector<2x8x32xf32>
      tpu.vector_store %arg21[%c0_109, %c0_110, %c0_111], %230 {strides = array<i32>} : memref<2x8x32xf32, #tpu.memory_space<vmem>>, vector<2x8x32xf32>,
    } else {
    }
    %c0 = arith.constant 0 : index
    %c0_1 = arith.constant 0 : index
    %c0_2 = arith.constant 0 : index
    %3 = vector.load %arg21[%c0, %c0_1, %c0_2] : memref<2x8x32xf32, #tpu.memory_space<vmem>>, vector<2x8x32xf32>
    %c0_3 = arith.constant 0 : index
    %c0_4 = arith.constant 0 : index
    %4 = vector.load %arg19[%c0_3, %c0_4] : memref<8x8xf32, #tpu.memory_space<vmem>>, vector<8x8xf32>
    %c0_5 = arith.constant 0 : index
    %c0_6 = arith.constant 0 : index
    %c0_7 = arith.constant 0 : index
    %5 = vector.load %arg3[%c0_5, %c0_6, %c0_7] : memref<1x1x32xf32, #tpu.memory_space<vmem>>, vector<1x1x32xf32>
    %6 = vector.shape_cast %5 : vector<1x1x32xf32> to vector<1x32xf32>
    %c0_8 = arith.constant 0 : index
    %c0_9 = arith.constant 0 : index
    %c0_10 = arith.constant 0 : index
    %7 = vector.load %arg4[%c0_8, %c0_9, %c0_10] : memref<1x1x32xf32, #tpu.memory_space<vmem>>, vector<1x1x32xf32>
    %8 = vector.shape_cast %7 : vector<1x1x32xf32> to vector<1x32xf32>
    %cst = arith.constant dense<0.000000e+00> : vector<2x8xf32>
    %9 = vector.multi_reduction <add>, %3, %cst [2] : vector<2x8x32xf32> to vector<2x8xf32>
    %10 = vector.shape_cast %9 : vector<2x8xf32> to vector<2x8x1xf32>
    %cst_11 = arith.constant 3.200000e+01 : f32
    %11 = vector.broadcast %cst_11 : f32 to vector<2x8x1xf32>
    %12 = arith.divf %10, %11 : vector<2x8x1xf32>
    %13 = vector.broadcast %12 : vector<2x8x1xf32> to vector<2x8x32xf32>
    %14 = arith.subf %3, %13 : vector<2x8x32xf32>
    %15 = arith.mulf %14, %14 : vector<2x8x32xf32>
    %cst_12 = arith.constant dense<0.000000e+00> : vector<2x8xf32>
    %16 = vector.multi_reduction <add>, %15, %cst_12 [2] : vector<2x8x32xf32> to vector<2x8xf32>
    %17 = vector.shape_cast %16 : vector<2x8xf32> to vector<2x8x1xf32>
    %cst_13 = arith.constant 3.200000e+01 : f32
    %18 = vector.broadcast %cst_13 : f32 to vector<2x8x1xf32>
    %19 = arith.divf %17, %18 : vector<2x8x1xf32>
    %20 = vector.broadcast %12 : vector<2x8x1xf32> to vector<2x8x32xf32>
    %21 = arith.subf %3, %20 : vector<2x8x32xf32>
    %cst_14 = arith.constant 9.99999974E-6 : f32
    %22 = vector.broadcast %cst_14 : f32 to vector<2x8x1xf32>
    %23 = arith.addf %19, %22 : vector<2x8x1xf32>
    %24 = math.rsqrt %23 : vector<2x8x1xf32>
    %25 = vector.broadcast %24 : vector<2x8x1xf32> to vector<2x8x32xf32>
    %26 = arith.mulf %21, %25 : vector<2x8x32xf32>
    %27 = vector.shape_cast %6 : vector<1x32xf32> to vector<1x1x32xf32>
    %28 = vector.broadcast %27 : vector<1x1x32xf32> to vector<2x8x32xf32>
    %29 = arith.mulf %26, %28 : vector<2x8x32xf32>
    %30 = vector.shape_cast %8 : vector<1x32xf32> to vector<1x1x32xf32>
    %31 = vector.broadcast %30 : vector<1x1x32xf32> to vector<2x8x32xf32>
    %32 = arith.addf %29, %31 : vector<2x8x32xf32>
    %33 = arith.truncf %32 : vector<2x8x32xf32> to vector<2x8x32xbf16>
    %34 = vector.shape_cast %33 : vector<2x8x32xbf16> to vector<16x32xbf16>
    %c0_15 = arith.constant 0 : index
    %c0_16 = arith.constant 0 : index
    %c0_17 = arith.constant 0 : index
    %35 = vector.load %arg5[%c0_15, %c0_16, %c0_17] : memref<1x32x32xbf16, #tpu.memory_space<vmem>>, vector<1x32x32xbf16>
    %36 = vector.shape_cast %35 : vector<1x32x32xbf16> to vector<32x32xbf16>
    %cst_18 = arith.constant dense<0.000000e+00> : vector<16x32xf32>
    %37 = tpu.matmul %34, %36, %cst_18 {dimension_numbers = #tpu.dot_dimension_numbers<[1], [0], [0], [1], [0, 0, 1, 1], [], []>} : vector<16x32xbf16>, vector<32x32xbf16>, vector<16x32xf32> -> vector<16x32xf32>
    %c0_19 = arith.constant 0 : index
    %c0_20 = arith.constant 0 : index
    %c0_21 = arith.constant 0 : index
    %38 = vector.load %arg8[%c0_19, %c0_20, %c0_21] : memref<1x1x32xf32, #tpu.memory_space<vmem>>, vector<1x1x32xf32>
    %39 = vector.shape_cast %38 : vector<1x1x32xf32> to vector<1x32xf32>
    %40 = vector.broadcast %39 : vector<1x32xf32> to vector<16x32xf32>
    %41 = arith.addf %37, %40 : vector<16x32xf32>
    %42 = vector.shape_cast %41 : vector<16x32xf32> to vector<2x8x32xf32>
    %c0_22 = arith.constant 0 : index
    %c0_23 = arith.constant 0 : index
    %c0_24 = arith.constant 0 : index
    %43 = vector.load %arg6[%c0_22, %c0_23, %c0_24] : memref<1x32x32xbf16, #tpu.memory_space<vmem>>, vector<1x32x32xbf16>
    %44 = vector.shape_cast %43 : vector<1x32x32xbf16> to vector<32x32xbf16>
    %cst_25 = arith.constant dense<0.000000e+00> : vector<16x32xf32>
    %45 = tpu.matmul %34, %44, %cst_25 {dimension_numbers = #tpu.dot_dimension_numbers<[1], [0], [0], [1], [0, 0, 1, 1], [], []>} : vector<16x32xbf16>, vector<32x32xbf16>, vector<16x32xf32> -> vector<16x32xf32>
    %c0_26 = arith.constant 0 : index
    %c0_27 = arith.constant 0 : index
    %c0_28 = arith.constant 0 : index
    %46 = vector.load %arg9[%c0_26, %c0_27, %c0_28] : memref<1x1x32xf32, #tpu.memory_space<vmem>>, vector<1x1x32xf32>
    %47 = vector.shape_cast %46 : vector<1x1x32xf32> to vector<1x32xf32>
    %48 = vector.broadcast %47 : vector<1x32xf32> to vector<16x32xf32>
    %49 = arith.addf %45, %48 : vector<16x32xf32>
    %50 = vector.shape_cast %49 : vector<16x32xf32> to vector<2x8x32xf32>
    %c0_29 = arith.constant 0 : index
    %c0_30 = arith.constant 0 : index
    %c0_31 = arith.constant 0 : index
    %51 = vector.load %arg7[%c0_29, %c0_30, %c0_31] : memref<1x32x32xbf16, #tpu.memory_space<vmem>>, vector<1x32x32xbf16>
    %52 = vector.shape_cast %51 : vector<1x32x32xbf16> to vector<32x32xbf16>
    %cst_32 = arith.constant dense<0.000000e+00> : vector<16x32xf32>
    %53 = tpu.matmul %34, %52, %cst_32 {dimension_numbers = #tpu.dot_dimension_numbers<[1], [0], [0], [1], [0, 0, 1, 1], [], []>} : vector<16x32xbf16>, vector<32x32xbf16>, vector<16x32xf32> -> vector<16x32xf32>
    %c0_33 = arith.constant 0 : index
    %c0_34 = arith.constant 0 : index
    %c0_35 = arith.constant 0 : index
    %54 = vector.load %arg10[%c0_33, %c0_34, %c0_35] : memref<1x1x32xf32, #tpu.memory_space<vmem>>, vector<1x1x32xf32>
    %55 = vector.shape_cast %54 : vector<1x1x32xf32> to vector<1x32xf32>
    %56 = vector.broadcast %55 : vector<1x32xf32> to vector<16x32xf32>
    %57 = arith.addf %53, %56 : vector<16x32xf32>
    %58 = vector.shape_cast %57 : vector<16x32xf32> to vector<2x8x32xf32>
    %59 = vector.extract_strided_slice %42 {offsets = [0, 0, 0], sizes = [2, 8, 8], strides = [1, 1, 1]} : vector<2x8x32xf32> to vector<2x8x8xf32>
    %60 = arith.truncf %59 : vector<2x8x8xf32> to vector<2x8x8xbf16>
    %61 = vector.extract_strided_slice %50 {offsets = [0, 0, 0], sizes = [2, 8, 8], strides = [1, 1, 1]} : vector<2x8x32xf32> to vector<2x8x8xf32>
    %62 = arith.truncf %61 : vector<2x8x8xf32> to vector<2x8x8xbf16>
    %63 = vector.extract_strided_slice %58 {offsets = [0, 0, 0], sizes = [2, 8, 8], strides = [1, 1, 1]} : vector<2x8x32xf32> to vector<2x8x8xf32>
    %64 = arith.truncf %63 : vector<2x8x8xf32> to vector<2x8x8xbf16>
    "tpu.trace_start"() <{level = 10 : i32, message = "bqd,bkd->bqk"}> : () -> ()
    %cst_36 = arith.constant dense<0.000000e+00> : vector<2x8x8xf32>
    %65 = tpu.matmul %60, %62, %cst_36 {dimension_numbers = #tpu.dot_dimension_numbers<[2], [2], [1], [1], [0, 0, 0, 1, 1, 1], [0], [0]>} : vector<2x8x8xbf16>, vector<2x8x8xbf16>, vector<2x8x8xf32> -> vector<2x8x8xf32>
    "tpu.trace_stop"() : () -> ()
    %cst_37 = arith.constant 0.353553385 : f32
    %66 = vector.broadcast %cst_37 : f32 to vector<2x8x8xf32>
    %67 = arith.mulf %65, %66 : vector<2x8x8xf32>
    %68 = vector.shape_cast %4 : vector<8x8xf32> to vector<1x8x8xf32>
    %69 = vector.broadcast %68 : vector<1x8x8xf32> to vector<2x8x8xf32>
    %70 = arith.addf %67, %69 : vector<2x8x8xf32>
    %cst_38 = arith.constant dense<0xFF800000> : vector<2x8xf32>
    %71 = vector.multi_reduction <maximumf>, %70, %cst_38 [2] : vector<2x8x8xf32> to vector<2x8xf32>
    %72 = vector.shape_cast %71 : vector<2x8xf32> to vector<2x8x1xf32>
    %73 = vector.broadcast %72 : vector<2x8x1xf32> to vector<2x8x8xf32>
    %74 = arith.subf %70, %73 : vector<2x8x8xf32>
    %75 = math.exp %74 : vector<2x8x8xf32>
    %cst_39 = arith.constant dense<0.000000e+00> : vector<2x8xf32>
    %76 = vector.multi_reduction <add>, %75, %cst_39 [2] : vector<2x8x8xf32> to vector<2x8xf32>
    %77 = vector.shape_cast %76 : vector<2x8xf32> to vector<2x8x1xf32>
    %78 = tpu.reciprocal %77 {approx = true} : vector<2x8x1xf32> -> vector<2x8x1xf32>
    %79 = vector.broadcast %78 : vector<2x8x1xf32> to vector<2x8x8xf32>
    %80 = arith.mulf %75, %79 : vector<2x8x8xf32>
    %81 = arith.truncf %80 : vector<2x8x8xf32> to vector<2x8x8xbf16>
    "tpu.trace_start"() <{level = 10 : i32, message = "bqk,bkd->bqd"}> : () -> ()
    %cst_40 = arith.constant dense<0.000000e+00> : vector<2x8x8xf32>
    %82 = tpu.matmul %81, %64, %cst_40 {dimension_numbers = #tpu.dot_dimension_numbers<[2], [1], [1], [2], [0, 0, 0, 1, 1, 2], [0], [0]>} : vector<2x8x8xbf16>, vector<2x8x8xbf16>, vector<2x8x8xf32> -> vector<2x8x8xf32>
    "tpu.trace_stop"() : () -> ()
    %c0_41 = arith.constant 0 : index
    %c0_42 = arith.constant 0 : index
    %c0_43 = arith.constant 0 : index
    %83 = vector.load %arg22[%c0_41, %c0_42, %c0_43] : memref<2x8x32xf32, #tpu.memory_space<vmem>>, vector<2x8x8xf32>
    tpu.vector_store %arg22[%c0_41, %c0_42, %c0_43], %82 {strides = array<i32>} : memref<2x8x32xf32, #tpu.memory_space<vmem>>, vector<2x8x8xf32>,
    %84 = vector.extract_strided_slice %42 {offsets = [0, 0, 8], sizes = [2, 8, 8], strides = [1, 1, 1]} : vector<2x8x32xf32> to vector<2x8x8xf32>
    %85 = arith.truncf %84 : vector<2x8x8xf32> to vector<2x8x8xbf16>
    %86 = vector.extract_strided_slice %50 {offsets = [0, 0, 8], sizes = [2, 8, 8], strides = [1, 1, 1]} : vector<2x8x32xf32> to vector<2x8x8xf32>
    %87 = arith.truncf %86 : vector<2x8x8xf32> to vector<2x8x8xbf16>
    %88 = vector.extract_strided_slice %58 {offsets = [0, 0, 8], sizes = [2, 8, 8], strides = [1, 1, 1]} : vector<2x8x32xf32> to vector<2x8x8xf32>
    %89 = arith.truncf %88 : vector<2x8x8xf32> to vector<2x8x8xbf16>
    "tpu.trace_start"() <{level = 10 : i32, message = "bqd,bkd->bqk"}> : () -> ()
    %cst_44 = arith.constant dense<0.000000e+00> : vector<2x8x8xf32>
    %90 = tpu.matmul %85, %87, %cst_44 {dimension_numbers = #tpu.dot_dimension_numbers<[2], [2], [1], [1], [0, 0, 0, 1, 1, 1], [0], [0]>} : vector<2x8x8xbf16>, vector<2x8x8xbf16>, vector<2x8x8xf32> -> vector<2x8x8xf32>
    "tpu.trace_stop"() : () -> ()
    %cst_45 = arith.constant 0.353553385 : f32
    %91 = vector.broadcast %cst_45 : f32 to vector<2x8x8xf32>
    %92 = arith.mulf %90, %91 : vector<2x8x8xf32>
    %93 = vector.shape_cast %4 : vector<8x8xf32> to vector<1x8x8xf32>
    %94 = vector.broadcast %93 : vector<1x8x8xf32> to vector<2x8x8xf32>
    %95 = arith.addf %92, %94 : vector<2x8x8xf32>
    %cst_46 = arith.constant dense<0xFF800000> : vector<2x8xf32>
    %96 = vector.multi_reduction <maximumf>, %95, %cst_46 [2] : vector<2x8x8xf32> to vector<2x8xf32>
    %97 = vector.shape_cast %96 : vector<2x8xf32> to vector<2x8x1xf32>
    %98 = vector.broadcast %97 : vector<2x8x1xf32> to vector<2x8x8xf32>
    %99 = arith.subf %95, %98 : vector<2x8x8xf32>
    %100 = math.exp %99 : vector<2x8x8xf32>
    %cst_47 = arith.constant dense<0.000000e+00> : vector<2x8xf32>
    %101 = vector.multi_reduction <add>, %100, %cst_47 [2] : vector<2x8x8xf32> to vector<2x8xf32>
    %102 = vector.shape_cast %101 : vector<2x8xf32> to vector<2x8x1xf32>
    %103 = tpu.reciprocal %102 {approx = true} : vector<2x8x1xf32> -> vector<2x8x1xf32>
    %104 = vector.broadcast %103 : vector<2x8x1xf32> to vector<2x8x8xf32>
    %105 = arith.mulf %100, %104 : vector<2x8x8xf32>
    %106 = arith.truncf %105 : vector<2x8x8xf32> to vector<2x8x8xbf16>
    "tpu.trace_start"() <{level = 10 : i32, message = "bqk,bkd->bqd"}> : () -> ()
    %cst_48 = arith.constant dense<0.000000e+00> : vector<2x8x8xf32>
    %107 = tpu.matmul %106, %89, %cst_48 {dimension_numbers = #tpu.dot_dimension_numbers<[2], [1], [1], [2], [0, 0, 0, 1, 1, 2], [0], [0]>} : vector<2x8x8xbf16>, vector<2x8x8xbf16>, vector<2x8x8xf32> -> vector<2x8x8xf32>
    "tpu.trace_stop"() : () -> ()
    %c0_49 = arith.constant 0 : index
    %c0_50 = arith.constant 0 : index
    %c8 = arith.constant 8 : index
    %108 = vector.load %arg22[%c0_49, %c0_50, %c8] : memref<2x8x32xf32, #tpu.memory_space<vmem>>, vector<2x8x8xf32>
    tpu.vector_store %arg22[%c0_49, %c0_50, %c8], %107 {strides = array<i32>} : memref<2x8x32xf32, #tpu.memory_space<vmem>>, vector<2x8x8xf32>,
    %109 = vector.extract_strided_slice %42 {offsets = [0, 0, 16], sizes = [2, 8, 8], strides = [1, 1, 1]} : vector<2x8x32xf32> to vector<2x8x8xf32>
    %110 = arith.truncf %109 : vector<2x8x8xf32> to vector<2x8x8xbf16>
    %111 = vector.extract_strided_slice %50 {offsets = [0, 0, 16], sizes = [2, 8, 8], strides = [1, 1, 1]} : vector<2x8x32xf32> to vector<2x8x8xf32>
    %112 = arith.truncf %111 : vector<2x8x8xf32> to vector<2x8x8xbf16>
    %113 = vector.extract_strided_slice %58 {offsets = [0, 0, 16], sizes = [2, 8, 8], strides = [1, 1, 1]} : vector<2x8x32xf32> to vector<2x8x8xf32>
    %114 = arith.truncf %113 : vector<2x8x8xf32> to vector<2x8x8xbf16>
    "tpu.trace_start"() <{level = 10 : i32, message = "bqd,bkd->bqk"}> : () -> ()
    %cst_51 = arith.constant dense<0.000000e+00> : vector<2x8x8xf32>
    %115 = tpu.matmul %110, %112, %cst_51 {dimension_numbers = #tpu.dot_dimension_numbers<[2], [2], [1], [1], [0, 0, 0, 1, 1, 1], [0], [0]>} : vector<2x8x8xbf16>, vector<2x8x8xbf16>, vector<2x8x8xf32> -> vector<2x8x8xf32>
    "tpu.trace_stop"() : () -> ()
    %cst_52 = arith.constant 0.353553385 : f32
    %116 = vector.broadcast %cst_52 : f32 to vector<2x8x8xf32>
    %117 = arith.mulf %115, %116 : vector<2x8x8xf32>
    %118 = vector.shape_cast %4 : vector<8x8xf32> to vector<1x8x8xf32>
    %119 = vector.broadcast %118 : vector<1x8x8xf32> to vector<2x8x8xf32>
    %120 = arith.addf %117, %119 : vector<2x8x8xf32>
    %cst_53 = arith.constant dense<0xFF800000> : vector<2x8xf32>
    %121 = vector.multi_reduction <maximumf>, %120, %cst_53 [2] : vector<2x8x8xf32> to vector<2x8xf32>
    %122 = vector.shape_cast %121 : vector<2x8xf32> to vector<2x8x1xf32>
    %123 = vector.broadcast %122 : vector<2x8x1xf32> to vector<2x8x8xf32>
    %124 = arith.subf %120, %123 : vector<2x8x8xf32>
    %125 = math.exp %124 : vector<2x8x8xf32>
    %cst_54 = arith.constant dense<0.000000e+00> : vector<2x8xf32>
    %126 = vector.multi_reduction <add>, %125, %cst_54 [2] : vector<2x8x8xf32> to vector<2x8xf32>
    %127 = vector.shape_cast %126 : vector<2x8xf32> to vector<2x8x1xf32>
    %128 = tpu.reciprocal %127 {approx = true} : vector<2x8x1xf32> -> vector<2x8x1xf32>
    %129 = vector.broadcast %128 : vector<2x8x1xf32> to vector<2x8x8xf32>
    %130 = arith.mulf %125, %129 : vector<2x8x8xf32>
    %131 = arith.truncf %130 : vector<2x8x8xf32> to vector<2x8x8xbf16>
    "tpu.trace_start"() <{level = 10 : i32, message = "bqk,bkd->bqd"}> : () -> ()
    %cst_55 = arith.constant dense<0.000000e+00> : vector<2x8x8xf32>
    %132 = tpu.matmul %131, %114, %cst_55 {dimension_numbers = #tpu.dot_dimension_numbers<[2], [1], [1], [2], [0, 0, 0, 1, 1, 2], [0], [0]>} : vector<2x8x8xbf16>, vector<2x8x8xbf16>, vector<2x8x8xf32> -> vector<2x8x8xf32>
    "tpu.trace_stop"() : () -> ()
    %c0_56 = arith.constant 0 : index
    %c0_57 = arith.constant 0 : index
    %c16 = arith.constant 16 : index
    %133 = vector.load %arg22[%c0_56, %c0_57, %c16] : memref<2x8x32xf32, #tpu.memory_space<vmem>>, vector<2x8x8xf32>
    tpu.vector_store %arg22[%c0_56, %c0_57, %c16], %132 {strides = array<i32>} : memref<2x8x32xf32, #tpu.memory_space<vmem>>, vector<2x8x8xf32>,
    %134 = vector.extract_strided_slice %42 {offsets = [0, 0, 24], sizes = [2, 8, 8], strides = [1, 1, 1]} : vector<2x8x32xf32> to vector<2x8x8xf32>
    %135 = arith.truncf %134 : vector<2x8x8xf32> to vector<2x8x8xbf16>
    %136 = vector.extract_strided_slice %50 {offsets = [0, 0, 24], sizes = [2, 8, 8], strides = [1, 1, 1]} : vector<2x8x32xf32> to vector<2x8x8xf32>
    %137 = arith.truncf %136 : vector<2x8x8xf32> to vector<2x8x8xbf16>
    %138 = vector.extract_strided_slice %58 {offsets = [0, 0, 24], sizes = [2, 8, 8], strides = [1, 1, 1]} : vector<2x8x32xf32> to vector<2x8x8xf32>
    %139 = arith.truncf %138 : vector<2x8x8xf32> to vector<2x8x8xbf16>
    "tpu.trace_start"() <{level = 10 : i32, message = "bqd,bkd->bqk"}> : () -> ()
    %cst_58 = arith.constant dense<0.000000e+00> : vector<2x8x8xf32>
    %140 = tpu.matmul %135, %137, %cst_58 {dimension_numbers = #tpu.dot_dimension_numbers<[2], [2], [1], [1], [0, 0, 0, 1, 1, 1], [0], [0]>} : vector<2x8x8xbf16>, vector<2x8x8xbf16>, vector<2x8x8xf32> -> vector<2x8x8xf32>
    "tpu.trace_stop"() : () -> ()
    %cst_59 = arith.constant 0.353553385 : f32
    %141 = vector.broadcast %cst_59 : f32 to vector<2x8x8xf32>
    %142 = arith.mulf %140, %141 : vector<2x8x8xf32>
    %143 = vector.shape_cast %4 : vector<8x8xf32> to vector<1x8x8xf32>
    %144 = vector.broadcast %143 : vector<1x8x8xf32> to vector<2x8x8xf32>
    %145 = arith.addf %142, %144 : vector<2x8x8xf32>
    %cst_60 = arith.constant dense<0xFF800000> : vector<2x8xf32>
    %146 = vector.multi_reduction <maximumf>, %145, %cst_60 [2] : vector<2x8x8xf32> to vector<2x8xf32>
    %147 = vector.shape_cast %146 : vector<2x8xf32> to vector<2x8x1xf32>
    %148 = vector.broadcast %147 : vector<2x8x1xf32> to vector<2x8x8xf32>
    %149 = arith.subf %145, %148 : vector<2x8x8xf32>
    %150 = math.exp %149 : vector<2x8x8xf32>
    %cst_61 = arith.constant dense<0.000000e+00> : vector<2x8xf32>
    %151 = vector.multi_reduction <add>, %150, %cst_61 [2] : vector<2x8x8xf32> to vector<2x8xf32>
    %152 = vector.shape_cast %151 : vector<2x8xf32> to vector<2x8x1xf32>
    %153 = tpu.reciprocal %152 {approx = true} : vector<2x8x1xf32> -> vector<2x8x1xf32>
    %154 = vector.broadcast %153 : vector<2x8x1xf32> to vector<2x8x8xf32>
    %155 = arith.mulf %150, %154 : vector<2x8x8xf32>
    %156 = arith.truncf %155 : vector<2x8x8xf32> to vector<2x8x8xbf16>
    "tpu.trace_start"() <{level = 10 : i32, message = "bqk,bkd->bqd"}> : () -> ()
    %cst_62 = arith.constant dense<0.000000e+00> : vector<2x8x8xf32>
    %157 = tpu.matmul %156, %139, %cst_62 {dimension_numbers = #tpu.dot_dimension_numbers<[2], [1], [1], [2], [0, 0, 0, 1, 1, 2], [0], [0]>} : vector<2x8x8xbf16>, vector<2x8x8xbf16>, vector<2x8x8xf32> -> vector<2x8x8xf32>
    "tpu.trace_stop"() : () -> ()
    %c0_63 = arith.constant 0 : index
    %c0_64 = arith.constant 0 : index
    %c24 = arith.constant 24 : index
    %158 = vector.load %arg22[%c0_63, %c0_64, %c24] : memref<2x8x32xf32, #tpu.memory_space<vmem>>, vector<2x8x8xf32>
    tpu.vector_store %arg22[%c0_63, %c0_64, %c24], %157 {strides = array<i32>} : memref<2x8x32xf32, #tpu.memory_space<vmem>>, vector<2x8x8xf32>,
    %c0_65 = arith.constant 0 : index
    %c0_66 = arith.constant 0 : index
    %c0_67 = arith.constant 0 : index
    %159 = vector.load %arg22[%c0_65, %c0_66, %c0_67] : memref<2x8x32xf32, #tpu.memory_space<vmem>>, vector<2x8x32xf32>
    %160 = arith.truncf %159 : vector<2x8x32xf32> to vector<2x8x32xbf16>
    %161 = vector.shape_cast %160 : vector<2x8x32xbf16> to vector<16x32xbf16>
    %c0_68 = arith.constant 0 : index
    %c0_69 = arith.constant 0 : index
    %c0_70 = arith.constant 0 : index
    %162 = vector.load %arg11[%c0_68, %c0_69, %c0_70] : memref<1x32x32xbf16, #tpu.memory_space<vmem>>, vector<1x32x32xbf16>
    %163 = vector.shape_cast %162 : vector<1x32x32xbf16> to vector<32x32xbf16>
    %cst_71 = arith.constant dense<0.000000e+00> : vector<16x32xf32>
    %164 = tpu.matmul %161, %163, %cst_71 {dimension_numbers = #tpu.dot_dimension_numbers<[1], [0], [0], [1], [0, 0, 1, 1], [], []>} : vector<16x32xbf16>, vector<32x32xbf16>, vector<16x32xf32> -> vector<16x32xf32>
    %c0_72 = arith.constant 0 : index
    %c0_73 = arith.constant 0 : index
    %c0_74 = arith.constant 0 : index
    %165 = vector.load %arg12[%c0_72, %c0_73, %c0_74] : memref<1x1x32xf32, #tpu.memory_space<vmem>>, vector<1x1x32xf32>
    %166 = vector.shape_cast %165 : vector<1x1x32xf32> to vector<1x32xf32>
    %167 = vector.broadcast %166 : vector<1x32xf32> to vector<16x32xf32>
    %168 = arith.addf %164, %167 : vector<16x32xf32>
    %169 = vector.shape_cast %168 : vector<16x32xf32> to vector<2x8x32xf32>
    %170 = arith.addf %3, %169 : vector<2x8x32xf32>
    %c0_75 = arith.constant 0 : index
    %c0_76 = arith.constant 0 : index
    %c0_77 = arith.constant 0 : index
    %171 = vector.load %arg13[%c0_75, %c0_76, %c0_77] : memref<1x1x32xf32, #tpu.memory_space<vmem>>, vector<1x1x32xf32>
    %172 = vector.shape_cast %171 : vector<1x1x32xf32> to vector<1x32xf32>
    %c0_78 = arith.constant 0 : index
    %c0_79 = arith.constant 0 : index
    %c0_80 = arith.constant 0 : index
    %173 = vector.load %arg14[%c0_78, %c0_79, %c0_80] : memref<1x1x32xf32, #tpu.memory_space<vmem>>, vector<1x1x32xf32>
    %174 = vector.shape_cast %173 : vector<1x1x32xf32> to vector<1x32xf32>
    %cst_81 = arith.constant dense<0.000000e+00> : vector<2x8xf32>
    %175 = vector.multi_reduction <add>, %170, %cst_81 [2] : vector<2x8x32xf32> to vector<2x8xf32>
    %176 = vector.shape_cast %175 : vector<2x8xf32> to vector<2x8x1xf32>
    %cst_82 = arith.constant 3.200000e+01 : f32
    %177 = vector.broadcast %cst_82 : f32 to vector<2x8x1xf32>
    %178 = arith.divf %176, %177 : vector<2x8x1xf32>
    %179 = vector.broadcast %178 : vector<2x8x1xf32> to vector<2x8x32xf32>
    %180 = arith.subf %170, %179 : vector<2x8x32xf32>
    %181 = arith.mulf %180, %180 : vector<2x8x32xf32>
    %cst_83 = arith.constant dense<0.000000e+00> : vector<2x8xf32>
    %182 = vector.multi_reduction <add>, %181, %cst_83 [2] : vector<2x8x32xf32> to vector<2x8xf32>
    %183 = vector.shape_cast %182 : vector<2x8xf32> to vector<2x8x1xf32>
    %cst_84 = arith.constant 3.200000e+01 : f32
    %184 = vector.broadcast %cst_84 : f32 to vector<2x8x1xf32>
    %185 = arith.divf %183, %184 : vector<2x8x1xf32>
    %186 = vector.broadcast %178 : vector<2x8x1xf32> to vector<2x8x32xf32>
    %187 = arith.subf %170, %186 : vector<2x8x32xf32>
    %cst_85 = arith.constant 9.99999974E-6 : f32
    %188 = vector.broadcast %cst_85 : f32 to vector<2x8x1xf32>
    %189 = arith.addf %185, %188 : vector<2x8x1xf32>
    %190 = math.rsqrt %189 : vector<2x8x1xf32>
    %191 = vector.broadcast %190 : vector<2x8x1xf32> to vector<2x8x32xf32>
    %192 = arith.mulf %187, %191 : vector<2x8x32xf32>
    %193 = vector.shape_cast %172 : vector<1x32xf32> to vector<1x1x32xf32>
    %194 = vector.broadcast %193 : vector<1x1x32xf32> to vector<2x8x32xf32>
    %195 = arith.mulf %192, %194 : vector<2x8x32xf32>
    %196 = vector.shape_cast %174 : vector<1x32xf32> to vector<1x1x32xf32>
    %197 = vector.broadcast %196 : vector<1x1x32xf32> to vector<2x8x32xf32>
    %198 = arith.addf %195, %197 : vector<2x8x32xf32>
    %199 = arith.truncf %198 : vector<2x8x32xf32> to vector<2x8x32xbf16>
    %200 = vector.shape_cast %199 : vector<2x8x32xbf16> to vector<16x32xbf16>
    %c0_86 = arith.constant 0 : index
    %c0_87 = arith.constant 0 : index
    %c0_88 = arith.constant 0 : index
    %201 = vector.load %arg15[%c0_86, %c0_87, %c0_88] : memref<1x32x128xbf16, #tpu.memory_space<vmem>>, vector<1x32x128xbf16>
    %202 = vector.shape_cast %201 : vector<1x32x128xbf16> to vector<32x128xbf16>
    %cst_89 = arith.constant dense<0.000000e+00> : vector<16x128xf32>
    %203 = tpu.matmul %200, %202, %cst_89 {dimension_numbers = #tpu.dot_dimension_numbers<[1], [0], [0], [1], [0, 0, 1, 1], [], []>} : vector<16x32xbf16>, vector<32x128xbf16>, vector<16x128xf32> -> vector<16x128xf32>
    %c0_90 = arith.constant 0 : index
    %c0_91 = arith.constant 0 : index
    %c0_92 = arith.constant 0 : index
    %204 = vector.load %arg16[%c0_90, %c0_91, %c0_92] : memref<1x1x128xf32, #tpu.memory_space<vmem>>, vector<1x1x128xf32>
    %205 = vector.shape_cast %204 : vector<1x1x128xf32> to vector<1x128xf32>
    %206 = vector.broadcast %205 : vector<1x128xf32> to vector<16x128xf32>
    %207 = arith.addf %203, %206 : vector<16x128xf32>
    %cst_93 = arith.constant 1.702000e+00 : f32
    %208 = vector.broadcast %cst_93 : f32 to vector<16x128xf32>
    %209 = arith.mulf %208, %207 : vector<16x128xf32>
    %210 = arith.negf %209 : vector<16x128xf32>
    %211 = math.exp %210 : vector<16x128xf32>
    %cst_94 = arith.constant 1.000000e+00 : f32
    %212 = vector.broadcast %cst_94 : f32 to vector<16x128xf32>
    %213 = arith.addf %212, %211 : vector<16x128xf32>
    %214 = arith.divf %212, %213 : vector<16x128xf32>
    %215 = arith.mulf %207, %214 : vector<16x128xf32>
    %216 = arith.truncf %215 : vector<16x128xf32> to vector<16x128xbf16>
    %c0_95 = arith.constant 0 : index
    %c0_96 = arith.constant 0 : index
    %c0_97 = arith.constant 0 : index
    %217 = vector.load %arg17[%c0_95, %c0_96, %c0_97] : memref<1x128x32xbf16, #tpu.memory_space<vmem>>, vector<1x128x32xbf16>
    %218 = vector.shape_cast %217 : vector<1x128x32xbf16> to vector<128x32xbf16>
    %cst_98 = arith.constant dense<0.000000e+00> : vector<16x32xf32>
    %219 = tpu.matmul %216, %218, %cst_98 {dimension_numbers = #tpu.dot_dimension_numbers<[1], [0], [0], [1], [0, 0, 1, 1], [], []>} : vector<16x128xbf16>, vector<128x32xbf16>, vector<16x32xf32> -> vector<16x32xf32>
    %c0_99 = arith.constant 0 : index
    %c0_100 = arith.constant 0 : index
    %c0_101 = arith.constant 0 : index
    %220 = vector.load %arg18[%c0_99, %c0_100, %c0_101] : memref<1x1x32xf32, #tpu.memory_space<vmem>>, vector<1x1x32xf32>
    %221 = vector.shape_cast %220 : vector<1x1x32xf32> to vector<1x32xf32>
    %222 = vector.broadcast %221 : vector<1x32xf32> to vector<16x32xf32>
    %223 = arith.addf %219, %222 : vector<16x32xf32>
    %224 = vector.shape_cast %223 : vector<16x32xf32> to vector<2x8x32xf32>
    %225 = arith.addf %170, %224 : vector<2x8x32xf32>
    %c0_102 = arith.constant 0 : index
    %c0_103 = arith.constant 0 : index
    %c0_104 = arith.constant 0 : index
    %226 = vector.load %arg21[%c0_102, %c0_103, %c0_104] : memref<2x8x32xf32, #tpu.memory_space<vmem>>, vector<2x8x32xf32>
    tpu.vector_store %arg21[%c0_102, %c0_103, %c0_104], %225 {strides = array<i32>} : memref<2x8x32xf32, #tpu.memory_space<vmem>>, vector<2x8x32xf32>,
    %c1_i32 = arith.constant 1 : i32
    %227 = arith.cmpi eq, %arg1, %c1_i32 : i32
    %228 = arith.extui %227 : i1 to i32
    %c0_i32_105 = arith.constant 0 : i32
    %229 = arith.cmpi ne, %228, %c0_i32_105 : i32
    scf.if %229 {
      %c0_106 = arith.constant 0 : index
      %c0_107 = arith.constant 0 : index
      %c0_108 = arith.constant 0 : index
      %230 = vector.load %arg21[%c0_106, %c0_107, %c0_108] : memref<2x8x32xf32, #tpu.memory_space<vmem>>, vector<2x8x32xf32>
      %c0_109 = arith.constant 0 : index
      %c0_110 = arith.constant 0 : index
      %c0_111 = arith.constant 0 : index
      %231 = vector.load %arg20[%c0_109, %c0_110, %c0_111] : memref<2x8x32xf32, #tpu.memory_space<vmem>>, vector<2x8x32xf32>
      tpu.vector_store %arg20[%c0_109, %c0_110, %c0_111], %230 {strides = array<i32>} : memref<2x8x32xf32, #tpu.memory_space<vmem>>, vector<2x8x32xf32>,
    } else {
    }
    return
  }
  func.func @transform_0(%arg0: i32, %arg1: i32) -> (i32, i32, i32) {
    %c0_i32 = arith.constant 0 : i32
    %c0_i32_0 = arith.constant 0 : i32
    %c0_i32_1 = arith.constant 0 : i32
    return %arg0, %c0_i32, %c0_i32_0 : i32, i32, i32
  }
  func.func @transform_1(%arg0: i32, %arg1: i32) -> (i32, i32, i32) {
    %c0_i32 = arith.constant 0 : i32
    %c0_i32_0 = arith.constant 0 : i32
    %c0_i32_1 = arith.constant 0 : i32
    return %arg1, %c0_i32, %c0_i32_0 : i32, i32, i32
  }
  func.func @transform_2(%arg0: i32, %arg1: i32) -> (i32, i32, i32) {
    %c0_i32 = arith.constant 0 : i32
    %c0_i32_0 = arith.constant 0 : i32
    %c0_i32_1 = arith.constant 0 : i32
    return %arg1, %c0_i32, %c0_i32_0 : i32, i32, i32
  }
  func.func @transform_3(%arg0: i32, %arg1: i32) -> (i32, i32, i32) {
    %c0_i32 = arith.constant 0 : i32
    %c0_i32_0 = arith.constant 0 : i32
    %c0_i32_1 = arith.constant 0 : i32
    return %arg1, %c0_i32, %c0_i32_0 : i32, i32, i32
  }
  func.func @transform_4(%arg0: i32, %arg1: i32) -> (i32, i32, i32) {
    %c0_i32 = arith.constant 0 : i32
    %c0_i32_0 = arith.constant 0 : i32
    %c0_i32_1 = arith.constant 0 : i32
    return %arg1, %c0_i32, %c0_i32_0 : i32, i32, i32
  }
  func.func @transform_5(%arg0: i32, %arg1: i32) -> (i32, i32, i32) {
    %c0_i32 = arith.constant 0 : i32
    %c0_i32_0 = arith.constant 0 : i32
    %c0_i32_1 = arith.constant 0 : i32
    return %arg1, %c0_i32, %c0_i32_0 : i32, i32, i32
  }
  func.func @transform_6(%arg0: i32, %arg1: i32) -> (i32, i32, i32) {
    %c0_i32 = arith.constant 0 : i32
    %c0_i32_0 = arith.constant 0 : i32
    %c0_i32_1 = arith.constant 0 : i32
    return %arg1, %c0_i32, %c0_i32_0 : i32, i32, i32
  }
  func.func @transform_7(%arg0: i32, %arg1: i32) -> (i32, i32, i32) {
    %c0_i32 = arith.constant 0 : i32
    %c0_i32_0 = arith.constant 0 : i32
    %c0_i32_1 = arith.constant 0 : i32
    return %arg1, %c0_i32, %c0_i32_0 : i32, i32, i32
  }
  func.func @transform_8(%arg0: i32, %arg1: i32) -> (i32, i32, i32) {
    %c0_i32 = arith.constant 0 : i32
    %c0_i32_0 = arith.constant 0 : i32
    %c0_i32_1 = arith.constant 0 : i32
    return %arg1, %c0_i32, %c0_i32_0 : i32, i32, i32
  }
  func.func @transform_9(%arg0: i32, %arg1: i32) -> (i32, i32, i32) {
    %c0_i32 = arith.constant 0 : i32
    %c0_i32_0 = arith.constant 0 : i32
    %c0_i32_1 = arith.constant 0 : i32
    return %arg1, %c0_i32, %c0_i32_0 : i32, i32, i32
  }
  func.func @transform_10(%arg0: i32, %arg1: i32) -> (i32, i32, i32) {
    %c0_i32 = arith.constant 0 : i32
    %c0_i32_0 = arith.constant 0 : i32
    %c0_i32_1 = arith.constant 0 : i32
    return %arg1, %c0_i32, %c0_i32_0 : i32, i32, i32
  }
  func.func @transform_11(%arg0: i32, %arg1: i32) -> (i32, i32, i32) {
    %c0_i32 = arith.constant 0 : i32
    %c0_i32_0 = arith.constant 0 : i32
    %c0_i32_1 = arith.constant 0 : i32
    return %arg1, %c0_i32, %c0_i32_0 : i32, i32, i32
  }
  func.func @transform_12(%arg0: i32, %arg1: i32) -> (i32, i32, i32) {
    %c0_i32 = arith.constant 0 : i32
    %c0_i32_0 = arith.constant 0 : i32
    %c0_i32_1 = arith.constant 0 : i32
    return %arg1, %c0_i32, %c0_i32_0 : i32, i32, i32
  }
  func.func @transform_13(%arg0: i32, %arg1: i32) -> (i32, i32, i32) {
    %c0_i32 = arith.constant 0 : i32
    %c0_i32_0 = arith.constant 0 : i32
    %c0_i32_1 = arith.constant 0 : i32
    return %arg1, %c0_i32, %c0_i32_0 : i32, i32, i32
  }
  func.func @transform_14(%arg0: i32, %arg1: i32) -> (i32, i32, i32) {
    %c0_i32 = arith.constant 0 : i32
    %c0_i32_0 = arith.constant 0 : i32
    %c0_i32_1 = arith.constant 0 : i32
    return %arg1, %c0_i32, %c0_i32_0 : i32, i32, i32
  }
  func.func @transform_15(%arg0: i32, %arg1: i32) -> (i32, i32, i32) {
    %c0_i32 = arith.constant 0 : i32
    %c0_i32_0 = arith.constant 0 : i32
    %c0_i32_1 = arith.constant 0 : i32
    return %arg1, %c0_i32, %c0_i32_0 : i32, i32, i32
  }
  func.func @transform_16(%arg0: i32, %arg1: i32) -> (i32, i32, i32) {
    %c0_i32 = arith.constant 0 : i32
    %c0_i32_0 = arith.constant 0 : i32
    %c0_i32_1 = arith.constant 0 : i32
    return %arg1, %c0_i32, %c0_i32_0 : i32, i32, i32
  }
  func.func @transform_17(%arg0: i32, %arg1: i32) -> (i32, i32) {
    %c0_i32 = arith.constant 0 : i32
    %c0_i32_0 = arith.constant 0 : i32
    %c0_i32_1 = arith.constant 0 : i32
    return %c0_i32, %c0_i32_0 : i32, i32
  }
  func.func @transform_18(%arg0: i32, %arg1: i32) -> (i32, i32, i32) {
    %c0_i32 = arith.constant 0 : i32
    %c0_i32_0 = arith.constant 0 : i32
    %c0_i32_1 = arith.constant 0 : i32
    return %arg0, %c0_i32, %c0_i32_0 : i32, i32, i32
  }
}

module attributes {stable_mosaic.version = 11 : i64} {
  func.func @final_kernel(%arg0: memref<2x32xf32, #tpu.memory_space<vmem>>, %arg1: memref<1x32xf32, #tpu.memory_space<vmem>>, %arg2: memref<1x32xf32, #tpu.memory_space<vmem>>, %arg3: memref<32x16xf32, #tpu.memory_space<vmem>>, %arg4: memref<2x16xf32, #tpu.memory_space<vmem>>) attributes {dimension_semantics = [], scalar_prefetch = 0 : i64, scratch_operands = 0 : i64, tpu.core_type = #tpu.core_type<tc>} {
    %c0 = arith.constant 0 : index
    %c0_0 = arith.constant 0 : index
    %0 = vector.load %arg0[%c0, %c0_0] : memref<2x32xf32, #tpu.memory_space<vmem>>, vector<2x32xf32>
    %c0_1 = arith.constant 0 : index
    %c0_2 = arith.constant 0 : index
    %1 = vector.load %arg1[%c0_1, %c0_2] : memref<1x32xf32, #tpu.memory_space<vmem>>, vector<1x32xf32>
    %c0_3 = arith.constant 0 : index
    %c0_4 = arith.constant 0 : index
    %2 = vector.load %arg2[%c0_3, %c0_4] : memref<1x32xf32, #tpu.memory_space<vmem>>, vector<1x32xf32>
    %cst = arith.constant dense<0.000000e+00> : vector<2xf32>
    %3 = vector.multi_reduction <add>, %0, %cst [1] : vector<2x32xf32> to vector<2xf32>
    %4 = vector.shape_cast %3 : vector<2xf32> to vector<2x1xf32>
    %cst_5 = arith.constant 3.200000e+01 : f32
    %5 = vector.broadcast %cst_5 : f32 to vector<2x1xf32>
    %6 = arith.divf %4, %5 : vector<2x1xf32>
    %7 = vector.broadcast %6 : vector<2x1xf32> to vector<2x32xf32>
    %8 = arith.subf %0, %7 : vector<2x32xf32>
    %9 = arith.mulf %8, %8 : vector<2x32xf32>
    %cst_6 = arith.constant dense<0.000000e+00> : vector<2xf32>
    %10 = vector.multi_reduction <add>, %9, %cst_6 [1] : vector<2x32xf32> to vector<2xf32>
    %11 = vector.shape_cast %10 : vector<2xf32> to vector<2x1xf32>
    %cst_7 = arith.constant 3.200000e+01 : f32
    %12 = vector.broadcast %cst_7 : f32 to vector<2x1xf32>
    %13 = arith.divf %11, %12 : vector<2x1xf32>
    %14 = vector.broadcast %6 : vector<2x1xf32> to vector<2x32xf32>
    %15 = arith.subf %0, %14 : vector<2x32xf32>
    %cst_8 = arith.constant 9.99999974E-6 : f32
    %16 = vector.broadcast %cst_8 : f32 to vector<2x1xf32>
    %17 = arith.addf %13, %16 : vector<2x1xf32>
    %18 = math.rsqrt %17 : vector<2x1xf32>
    %19 = vector.broadcast %18 : vector<2x1xf32> to vector<2x32xf32>
    %20 = arith.mulf %15, %19 : vector<2x32xf32>
    %21 = vector.broadcast %1 : vector<1x32xf32> to vector<2x32xf32>
    %22 = arith.mulf %20, %21 : vector<2x32xf32>
    %23 = vector.broadcast %2 : vector<1x32xf32> to vector<2x32xf32>
    %24 = arith.addf %22, %23 : vector<2x32xf32>
    %c0_9 = arith.constant 0 : index
    %c0_10 = arith.constant 0 : index
    %25 = vector.load %arg3[%c0_9, %c0_10] : memref<32x16xf32, #tpu.memory_space<vmem>>, vector<32x16xf32>
    %cst_11 = arith.constant dense<0.000000e+00> : vector<2x16xf32>
    %26 = tpu.matmul %24, %25, %cst_11 {dimension_numbers = #tpu.dot_dimension_numbers<[1], [0], [0], [1], [0, 0, 1, 1], [], []>} : vector<2x32xf32>, vector<32x16xf32>, vector<2x16xf32> -> vector<2x16xf32>
    %c0_12 = arith.constant 0 : index
    %c0_13 = arith.constant 0 : index
    %27 = vector.load %arg4[%c0_12, %c0_13] : memref<2x16xf32, #tpu.memory_space<vmem>>, vector<2x16xf32>
    tpu.vector_store %arg4[%c0_12, %c0_13], %26 {strides = array<i32>} : memref<2x16xf32, #tpu.memory_space<vmem>>, vector<2x16xf32>,
    return
  }
}

</mosaic_0001>

<bundles_post_ra>
// kernel: text_model_forward.3
= control target key start
LH: loop header
LB: loop body
LE: loop exit
PB: predicated region body
PF: predicated region fallthrough
CT: control target
= control target key end

     0   :  { %vm21_vm0 = vcmask 254976   ;;  %s261_s0 = inlined_call_operand.vmem [shape: f32[2,32], index: 0, kind: input, shape index: {}]   ;;  %s262_s1 = inlined_call_operand.vmem [shape: f32[1,32], index: 1, kind: input, shape index: {}]   ;;  %s263_s2 = inlined_call_operand.vmem [shape: f32[1,32], index: 2, kind: input, shape index: {}]   ;;  %s264_s3 = inlined_call_operand.vmem [shape: f32[32,16], index: 3, kind: input, shape index: {}]   ;;  %s265_s4 = inlined_call_operand.hbm [shape: f32[2,16], index: 4, kind: output, shape index: {}]  }
   0x1   :  { %v18_v0 = vld [vmem:[%s261_s0] sm:$0x3] }
   0x2   :  { %9 = vsyncpa [#allocation3], 0  ;;  %v22_v1 = vsel %vm21_vm0, %v18_v0, 0.0  ;;  %v50_v7 = vld [vmem:[%s264_s3] sm:$0xff]  ;;  %v51_v8 = vld [vmem:[%s264_s3 + $0x8] sm:$0xff]  ;;  %v199_v10 = vmov 0.0|0.0  }
   0x3   :  { %23 = vadd.xlane.f32.xlu0 %v22_v1  ;;  %v52_v9 = vld [vmem:[%s264_s3 + $0x10] sm:$0xff]  ;;  %163 = vmatprep.subr.bf16.mxu0 %v199_v10  ;;  %v164_v11 = vpack.c.bf16 %v51_v8, %v50_v7  ;;  %v53_v12 = vld [vmem:[%s264_s3 + $0x18] sm:$0xff]  ;;  %vm200_vm1 = vmmov 0   ;;  %v201_v13 = vmov 0.0   ;;  %v144_v19 = vld [vmem:[%s262_s1] ss:$0 sm:$0xff] }
   0x4   :  { %160 = vmatprep.mubr.msk.f32.mxu0 %vm200_vm1, %v201_v13  ;;  %v167_v14 = vpack.c.bf16 %v53_v12, %v52_v9  ;;  %v145_v21 = vld [vmem:[%s263_s2] ss:$0 sm:$0xff]  ;;  %vm54_vm2 = vcmask 261120   ;;  %s202_s3 = smov [#allocation2]   ;;  %vm128_vm3 = vcmask 123904  }
   0x5   :  { %165 = vmatpush3.bf16.msra.mxu0 %v164_v11  ;;  %s136_s28 = sshll.u32 %s202_s3, 4  ;;  %s137_s28 = int_to_ptr.vmem [resolvable:$true] %s136_s28 }
   0x6   :  { %166 = vmatprep.subr.bf16.mxu0 %v199_v10  ;;  %s175_s29 = scalar_lea.vmem %s137_s28, 32  ;;  %p180_p1 = scmp.lt.s32.totalorder %s137_s28, %s137_s28 }
   0x7   :  { %p176_p0 = scmp.ne.s32.totalorder %s137_s28, %s175_s29  ;;  %p181_p2 = scmp.lt.s32.totalorder %s175_s29, %s175_s29 }
   0x9   :  { %168 = vmatpush3.bf16.msra.mxu0 %v167_v14  ;;  %p182_p3 = por %p181_p2, %p180_p1 }
   0xb   :  { %p183_p4 = pnand %p182_p3, %p176_p0 }
  0x90   :  { %v24_v2 = vpop.xlane.xlu0 %23 }
  0x91   :  { %v26_v3 = vmul.f32 0.03125, %v24_v2 }
  0x93   :  { %v27_v4 = vsub.f32 %v18_v0, %v26_v3 }
  0x95   :  { %v28_v5 = vmul.f32 %v27_v4, %v27_v4 }
  0x97   :  { %v29_v6 = vsel %vm21_vm0, %v28_v5, 0.0 }
  0x98   :  { %30 = vadd.xlane.f32.xlu0 %v29_v6 }
 0x125   :  { %v31_v15 = vpop.xlane.xlu0 %30 }
 0x126   :  { %v32_v16 = vmul.f32 0.03125, %v31_v15 }
 0x128   :  { %v33_v17 = vadd.f32 1e-05, %v32_v16 }
 0x12a   :  { %173 = vrsqrt.f32 %v33_v17 }
 0x134   :  { %v174_v18 = vpop.eup %173 }
 0x135   :  { %v35_v20 = vmul.f32 %v174_v18, %v27_v4 }
 0x137   :  { %v42_v22 = vmul.f32 %v144_v19, %v35_v20 }
 0x139   :  { %v49_v23 = vadd.f32 %v145_v21, %v42_v22 }
 0x13b   :  { %161 = vmatmul.mubr.msk.f32.vlgmr.msra.gmra.mrb[0].mxu0 %vm54_vm2, %v49_v23 }
 0x20e   :  { %v124_v24 = vpop.f32.mrb[0].mxu0 }
 0x20f   :  { %129 = vst.msk [vmem:[#allocation2] sm:$0x3] %vm128_vm3, %v124_v24  ;;  %v162_v25 = vpop.f32.mrb[1].mxu0 }
 0x210   :  { %186 = shalt.err (!%p183_p4)
}
 0x211   :  { %s187_s30 = scalar_lea.hbm %s265_s4, 32 }
 0x212   :  { %p188_p5 = scmp.ne.s32.totalorder %s265_s4, %s187_s30  ;;  %p191_p6 = scmp.lt.u32.totalorder %s187_s30, %s265_s4 }
 0x214   :  { %p193_p7 = pnand %p191_p6, %p188_p5 }
 0x216   :  { %196 = shalt.err (!%p193_p7)
}
 0x217   :  { %139 = dma.vmem_to_hbm [thread:$0]  %s137_s28, 32, %s265_s4, [#allocation3]  }
 0x218   :  { %197 = dma.done.wait [#allocation3], 32  }
 0x219   :  { %198 = vsyncadd [#allocation3], 4294967264 }
 0x21a   :  { %143 = vsyncpa [#allocation3], 1 }

// kernel: text_model_forward.2
= control target key start
LH: loop header
LB: loop body
LE: loop exit
PB: predicated region body
PF: predicated region fallthrough
CT: control target
= control target key end

     0   :  { %s5353_s0 = inlined_call_operand.hbm [shape: f32[2,8,32], index: 0, kind: input, shape index: {}]   ;;  %s5354_s1 = inlined_call_operand.hbm [shape: f32[2,1,32], index: 1, kind: input, shape index: {}]   ;;  %s5355_s2 = inlined_call_operand.hbm [shape: f32[2,1,32], index: 2, kind: input, shape index: {}]   ;;  %s5356_s3 = inlined_call_operand.hbm [shape: bf16[2,32,32], index: 3, kind: input, shape index: {}]   ;;  %s5357_s4 = inlined_call_operand.hbm [shape: bf16[2,32,32], index: 4, kind: input, shape index: {}]   ;;  %s5358_s5 = inlined_call_operand.hbm [shape: bf16[2,32,32], index: 5, kind: input, shape index: {}]   ;;  %s5359_s6 = inlined_call_operand.hbm [shape: f32[2,1,32], index: 6, kind: input, shape index: {}]   ;;  %s5360_s7 = inlined_call_operand.hbm [shape: f32[2,1,32], index: 7, kind: input, shape index: {}]   ;;  %s5361_s8 = inlined_call_operand.hbm [shape: f32[2,1,32], index: 8, kind: input, shape index: {}]   ;;  %s5362_s9 = inlined_call_operand.hbm [shape: bf16[2,32,32], index: 9, kind: input, shape index: {}]   ;;  %s5363_s10 = inlined_call_operand.hbm [shape: f32[2,1,32], index: 10, kind: input, shape index: {}]   ;;  %s5364_s11 = inlined_call_operand.hbm [shape: f32[2,1,32], index: 11, kind: input, shape index: {}]   ;;  %s5365_s12 = inlined_call_operand.hbm [shape: f32[2,1,32], index: 12, kind: input, shape index: {}]   ;;  %s5366_s13 = inlined_call_operand.hbm [shape: bf16[2,32,128], index: 13, kind: input, shape index: {}]   ;;  %s5367_s14 = inlined_call_operand.hbm [shape: f32[2,1,128], index: 14, kind: input, shape index: {}]   ;;  %s5368_s15 = inlined_call_operand.hbm [shape: bf16[2,128,32], index: 15, kind: input, shape index: {}]   ;;  %s5369_s16 = inlined_call_operand.hbm [shape: f32[2,1,32], index: 16, kind: input, shape index: {}]   ;;  %s5370_s17 = inlined_call_operand.hbm [shape: f32[8,8], index: 17, kind: input, shape index: {}]   ;;  %s5371_s18 = inlined_call_operand.hbm [shape: f32[2,8,32], index: 18, kind: output, shape index: {}]  }
   0x1   :  { %5404 = sst [smem:[#allocation52_spill]] %s5353_s0 }
   0x2   :  { %5405 = sst [smem:[#allocation53_spill]] %s5354_s1 }
   0x3   :  { %5406 = sst [smem:[#allocation54_spill]] %s5355_s2 }
   0x4   :  { %5407 = sst [smem:[#allocation55_spill]] %s5356_s3 }
   0x5   :  { %5408 = sst [smem:[#allocation56_spill]] %s5358_s5 }
   0x6   :  { %5409 = sst [smem:[#allocation57_spill]] %s5360_s7 }
   0x7   :  { %5410 = sst [smem:[#allocation58_spill]] %s5365_s12 }
   0x8   :  { %5411 = sst [smem:[#allocation59_spill]] %s5367_s14 }
   0x9   :  { %5412 = sst [smem:[#allocation60_spill]] %s5369_s16 }
   0xa   :  { %5413 = sst [smem:[#allocation61_spill]] %s5370_s17 }
   0xb   :  { %5414 = sst [smem:[#allocation62_spill]] %s5371_s18 }
   0xc   :  { %23 = vsyncpa [#allocation5], 0 }
   0xd   :  { %24 = vsyncpa [#allocation8], 0 }
   0xe   :  { %26 = vsyncpa [#allocation8 + $0x1], 0 }
   0xf   :  { %27 = vsyncpa [#allocation11], 0 }
  0x10   :  { %29 = vsyncpa [#allocation11 + $0x1], 0 }
  0x11   :  { %30 = vsyncpa [#allocation14], 0 }
  0x12   :  { %32 = vsyncpa [#allocation14 + $0x1], 0 }
  0x13   :  { %33 = vsyncpa [#allocation17], 0 }
  0x14   :  { %35 = vsyncpa [#allocation17 + $0x1], 0 }
  0x15   :  { %36 = vsyncpa [#allocation20], 0 }
  0x16   :  { %38 = vsyncpa [#allocation20 + $0x1], 0 }
  0x17   :  { %39 = vsyncpa [#allocation23], 0 }
  0x18   :  { %41 = vsyncpa [#allocation23 + $0x1], 0 }
  0x19   :  { %42 = vsyncpa [#allocation26], 0 }
  0x1a   :  { %44 = vsyncpa [#allocation26 + $0x1], 0 }
  0x1b   :  { %45 = vsyncpa [#allocation29], 0 }
  0x1c   :  { %47 = vsyncpa [#allocation29 + $0x1], 0 }
  0x1d   :  { %48 = vsyncpa [#allocation32], 0 }
  0x1e   :  { %49 = vsyncpa [#allocation6], 0  ;;  %s4331_s27 = smov 0   ;;  %s4333_s28 = smov 0  }
  0x1f   :  { %s4335_s29 = smov 0   ;;  %s4337_s30 = smov 0  }
  0x20   :  { %s4339_s0 = smov 0   ;;  %s4341_s19 = smov 0  }
  0x21 LB: > { %5415 = sst [smem:[#allocation45_spill]] %s4186_s28  ;;  %s4360_s1 = sadd.s32 4294967295, %s4202_s19   ;;  %s4202_s19 = sphi %s4341_s19, %s55_s19   ;;  %s4198_s0 = sphi %s4339_s0, %s5479_s0   ;;  %s4194_s30 = sphi %s4337_s30, %s5478_s30   ;;  %s4190_s29 = sphi %s4335_s29, %s5477_s29   ;;  %s4186_s28 = sphi %s4333_s28, %s5476_s28   ;;  %s4182_s27 = sphi %s4331_s27, %s5473_s27  }
  0x22   : > { %5416 = sst [smem:[#allocation46_spill]] %s4194_s30  ;;  %s64_s20 = sadd.s32 1, %s4198_s0 }
  0x23   : > { %5417 = sst [smem:[#allocation47_spill]] %s4360_s1  ;;  %p65_p0 = scmp.ge.s32.totalorder %s64_s20, 2 }
  0x24   : > { %s100_s21 = sadd.s32 1, %s4190_s29  ;;  %p107_p1 = scmp.ne.s32.totalorder %s4190_s29, %s4186_s28 }
  0x25   : > { %p108_p2 = scmp.eq.s32.totalorder %s4202_s19, 0  ;;  %s5481_s20 = smov (%p65_p0, %s64_s20), 0 }
  0x26   : > { %5418 = sst [smem:[#allocation48_spill]] %s5481_s20  ;;  %p113_p4 = scmp.ne.s32.totalorder %s4186_s28, %s4182_s27 }
  0x27   : > { %p4369_p3 = por %p108_p2, %p107_p1  ;;  %s97_s2 = ssub.s32 %s4198_s0, %s5481_s20 }
  0x28   : > { %p5385_p5 = scmp.eq.s32.totalorder %s4360_s1, 0  ;;  %p98_p6 = scmp.eq.s32.totalorder %s97_s2, 0 }
  0x29   : > { %s5419_s22 = scalar_select %p4369_p3, 1, 0 }
  0x2a   : > { %p3073_p7 = scmp.ge.s32.totalorder %s4202_s19, 1  ;;  %p4380_p8 = por %p5385_p5, %p113_p4 }
  0x2b   : > { %p561_p9 = scmp.lt.s32.totalorder %s4202_s19, 3  ;;  %s4204_s26 = smov [#allocation4]  }
  0x2c   : > { %s5420_s23 = scalar_select %p4380_p8, 1, 0 }
  0x2d   : > { %s4386_s24 = scalar_select %p98_p6, %s4190_s29, %s100_s21  }
  0x2e   : > { %5421 = sst [smem:[#allocation49_spill]] %s5420_s23  ;;  %p4388_p10 = pnand %p3073_p7, %p561_p9 }
  0x2f   : > { %5422 = sst [smem:[#allocation50_spill]] %s4386_s24  ;;  %s576_s27 = sshll.u32 %s4204_s26, 4  ;;  %s577_s27 = int_to_ptr.vmem [resolvable:$true] %s576_s27 }
  0x30   : > { %s5423_s25 = scalar_select %p4388_p10, 1, 0 }
  0x31   : > { %p3439_p11 = pneg %p4388_p10  ;;  %s4205_s20 = smov [#allocation31]  }
  0x32   : > { %5424 = sst [smem:[#allocation51_spill]] %s5423_s25  ;;  %s590_s21 = sshll.u32 %s4205_s20, 4  ;;  %s4400_s21 = int_to_ptr.vmem [resolvable:$true] %s590_s21 }
  0x33   : > { %p4396_p12 = pnand %p3439_p11, %p5385_p5  ;;  %s5426_s30 = sld [smem:[#allocation52_spill]] }
  0x35   : > { %p3584_p0 = pneg %p4396_p12 }
  0x39   : > { %s5427_s23 = smov %s5426_s30  ;;  %s3582_s28 = scalar_lea.hbm %s5426_s30, 256 }
  0x3a   : > { %p3583_p13 = scmp.ne.s32.totalorder %s5427_s23, %s3582_s28  ;;  %p3589_p4 = scmp.lt.u32.totalorder %s3582_s28, %s5427_s23 }
  0x3c   : > { %p3585_p1 = pnand %p3584_p0, %p3583_p13 }
  0x3e   : > { %p3586_p2 = pneg %p3585_p1 }
  0x40   : > { %p3591_p6 = pnand %p3589_p4, %p3586_p2 }
  0x42   : > { %3594 = shalt.err (!%p3591_p6)
}
  0x43   : > { %s3595_s20 = scalar_lea.vmem %s577_s27, 256  ;;  %p3603_p5 = scmp.lt.s32.totalorder %s577_s27, %s577_s27 }
  0x44   : > { %p3596_p7 = scmp.ne.s32.totalorder %s577_s27, %s3595_s20  ;;  %p3604_p8 = scmp.lt.s32.totalorder %s3595_s20, %s3595_s20 }
  0x46   : > { %p3598_p9 = pnand %p3596_p7, %p3584_p0  ;;  %p3605_p10 = por %p3604_p8, %p3603_p5 }
  0x48   : > { %p3599_p11 = pneg %p3598_p9 }
  0x4a   : > { %p3606_p3 = pnand %p3605_p10, %p3599_p11 }
  0x4c   : > { %3609 = shalt.err (!%p3606_p3)
}
  0x4d   : > { %s4206_s16 = smov 128   ;;  %s4207_s18 = smov 8  }
  0x4e   : > { %3442 = dma.hbm_to_vmem [thread:$0]  (!%p4396_p12), %s5427_s23, 256, %s577_s27, [#allocation5], %s4206_s16, %s4206_s16, %s4207_s18  }
  0x4f   : > { %s5428_s17 = sld [smem:[#allocation61_spill]] }
  0x55   : > { %s3610_s25 = scalar_lea.hbm %s5428_s17, 128 }
  0x56   : > { %p3611_p13 = scmp.ne.s32.totalorder %s5428_s17, %s3610_s25  ;;  %p3617_p8 = scmp.lt.u32.totalorder %s3610_s25, %s5428_s17 }
  0x58   : > { %p3613_p3 = pnand %p3611_p13, %p3584_p0 }
  0x5a   : > { %p3614_p5 = pneg %p3613_p3 }
  0x5c   : > { %p3619_p10 = pnand %p3617_p8, %p3614_p5 }
  0x5e   : > { %3622 = shalt.err (!%p3619_p10)
}
  0x5f   : > { %s3623_s27 = scalar_lea.vmem %s4400_s21, 128  ;;  %p3631_p6 = scmp.lt.s32.totalorder %s4400_s21, %s4400_s21 }
  0x60   : > { %p3624_p1 = scmp.ne.s32.totalorder %s4400_s21, %s3623_s27  ;;  %p3632_p7 = scmp.lt.s32.totalorder %s3623_s27, %s3623_s27 }
  0x62   : > { %p3626_p2 = pnand %p3624_p1, %p3584_p0  ;;  %p3633_p9 = por %p3632_p7, %p3631_p6 }
  0x64   : > { %p3627_p4 = pneg %p3626_p2 }
  0x66   : > { %p3634_p11 = pnand %p3633_p9, %p3627_p4 }
  0x68   : > { %3637 = shalt.err (!%p3634_p11)
}
  0x69   : > { %3445 = dma.hbm_to_vmem [thread:$0]  (!%p4396_p12), %s5428_s17, 128, %s4400_s21, [#allocation32]  }
  0x6a   : > { %p3076_p13 = scmp.ge.s32.totalorder %s4202_s19, 2 }
  0x6b   : > { %s4451_s16 = sand.u32 (!%p3076_p13), 1, %s4202_s19   ;;  %s4454_s18 = sand.u32 (!%p3076_p13), 1, %s4190_s29  }
  0x6c   : > { %597 = sbr.rel (%p3076_p13) target bundleno = 526 (0x20e), region = 24  ;;  %s4457_s28 = sshll.u32 (!%p3076_p13), %s4198_s0, 4 }
  0x6d   : > { %s604_s2 = scalar_lea.vmem (!%p3076_p13), [#allocation7], %s4454_s18  ;;  %s5429_s24 = sld [smem:[#allocation53_spill]] (!%p3076_p13) }
  0x6e   : > { %s611_s30 = sshll.u32 (!%p3076_p13), %s604_s2, 4  ;;  %p5430_p0 = scmp.ne.s32.totalorder (!%p3076_p13), %s5419_s22, 0  ;;  %s612_s30 = int_to_ptr.vmem [resolvable:$true] %s611_s30 }
  0x73   : > { %s4464_s25 = scalar_lea.hbm %s5429_s24, %s4457_s28  ;;  %s3642_s14 = scalar_lea.hbm %s5429_s24, 32 }
  0x74   : > { %s3638_s20 = scalar_lea.hbm %s4464_s25, 16  ;;  %p3643_p8 = scmp.lt.u32.totalorder %s4464_s25, %s5429_s24 }
  0x75   : > { %p3639_p12 = scmp.ne.s32.totalorder %s4464_s25, %s3638_s20  ;;  %p3644_p10 = scmp.lt.u32.totalorder %s3642_s14, %s3638_s20 }
  0x76   : > { %p3646_p2 = scmp.lt.u32.totalorder %s3638_s20, %s4464_s25 }
  0x77   : > { %p3640_p3 = pnand %p3639_p12, %p5430_p0  ;;  %p3645_p1 = por %p3644_p10, %p3643_p8 }
  0x79   : > { %p3641_p5 = pneg %p3640_p3  ;;  %p3647_p4 = por %p3646_p2, %p3645_p1 }
  0x7b   : > { %p3648_p6 = pnand %p3647_p4, %p3641_p5 }
  0x7d   : > { %3651 = shalt.err (!%p3648_p6)
}
  0x7e   : > { %s3652_s1 = scalar_lea.vmem %s612_s30, 16  ;;  %s4208_s21 = smov [#allocation7]  }
  0x7f   : > { %p3653_p7 = scmp.ne.s32.totalorder %s612_s30, %s3652_s1  ;;  %s3656_s26 = sshll.u32 %s4208_s21, 4  ;;  %s3657_s26 = int_to_ptr.vmem [resolvable:$false] %s3656_s26 }
  0x80   : > { %s3658_s27 = scalar_lea.vmem %s3657_s26, 32  ;;  %p3659_p13 = scmp.lt.s32.totalorder %s612_s30, %s3657_s26 }
  0x81   : > { %p3654_p9 = pnand %p3653_p7, %p5430_p0  ;;  %p3660_p12 = scmp.lt.s32.totalorder %s3658_s27, %s3652_s1 }
  0x83   : > { %p3655_p11 = pneg %p3654_p9  ;;  %p3661_p3 = por %p3660_p12, %p3659_p13 }
  0x85   : > { %p3662_p8 = pnand %p3661_p3, %p3655_p11 }
  0x87   : > { %3665 = shalt.err (!%p3662_p8)
}
  0x88   : > { %s5431_s17 = scalar_lea.sflag [#allocation8], %s4451_s16  ;;  %s4487_s20 = sshll.u32 %s4454_s18, 4 }
  0x89   : > { %3399 = dma.hbm_to_vmem [thread:$0]  (%p5430_p0), %s4464_s25, 16, %s612_s30, %s5431_s17  }
  0x8a   : > { %s4490_s12 = sshll.u32 %s4198_s0, 8  ;;  %s5432_s3 = sld [smem:[#allocation55_spill]] }
  0x8b   : > { %s639_s1 = scalar_lea.vmem [#allocation10], %s4487_s20  ;;  %s5393_s30 = scalar_lea.sflag [#allocation11], %s4451_s16 }
  0x8c   : > { %s646_s21 = sshll.u32 %s639_s1, 4  ;;  %s4499_s21 = int_to_ptr.vmem [resolvable:$true] %s646_s21 }
  0x90   : > { %s4496_s2 = scalar_lea.hbm %s5432_s3, %s4490_s12  ;;  %s3670_s26 = scalar_lea.hbm %s5432_s3, 512 }
  0x91   : > { %s3666_s25 = scalar_lea.hbm %s4496_s2, 256  ;;  %p3671_p2 = scmp.lt.u32.totalorder %s4496_s2, %s5432_s3 }
  0x92   : > { %p3667_p5 = scmp.ne.s32.totalorder %s4496_s2, %s3666_s25  ;;  %p3672_p4 = scmp.lt.u32.totalorder %s3670_s26, %s3666_s25 }
  0x93   : > { %p3674_p7 = scmp.lt.u32.totalorder %s3666_s25, %s4496_s2 }
  0x94   : > { %p3668_p10 = pnand %p3667_p5, %p5430_p0  ;;  %p3673_p6 = por %p3672_p4, %p3671_p2 }
  0x96   : > { %p3669_p1 = pneg %p3668_p10  ;;  %p3675_p9 = por %p3674_p7, %p3673_p6 }
  0x98   : > { %p3676_p11 = pnand %p3675_p9, %p3669_p1 }
  0x9a   : > { %3679 = shalt.err (!%p3676_p11)
}
  0x9b   : > { %s3680_s1 = scalar_lea.vmem %s4499_s21, 256  ;;  %s4209_s27 = smov [#allocation10]  }
  0x9c   : > { %p3681_p13 = scmp.ne.s32.totalorder %s4499_s21, %s3680_s1  ;;  %s3684_s17 = sshll.u32 %s4209_s27, 4  ;;  %s3685_s17 = int_to_ptr.vmem [resolvable:$false] %s3684_s17 }
  0x9d   : > { %s3686_s23 = scalar_lea.vmem %s3685_s17, 512  ;;  %p3687_p8 = scmp.lt.s32.totalorder %s4499_s21, %s3685_s17 }
  0x9e   : > { %p3682_p12 = pnand %p3681_p13, %p5430_p0  ;;  %p3688_p5 = scmp.lt.s32.totalorder %s3686_s23, %s3680_s1 }
  0xa0   : > { %p3683_p3 = pneg %p3682_p12  ;;  %p3689_p10 = por %p3688_p5, %p3687_p8 }
  0xa2   : > { %p3690_p2 = pnand %p3689_p10, %p3683_p3 }
  0xa4   : > { %3693 = shalt.err (!%p3690_p2)
}
  0xa5   : > { %s5395_s25 = smov 64   ;;  %s5399_s26 = smov 4  }
  0xa6   : > { %3401 = dma.hbm_to_vmem [thread:$0]  (%p5430_p0), %s4496_s2, 256, %s4499_s21, %s5393_s30, %s5395_s25, %s5395_s25, %s5399_s26  }
  0xa7   : > { %s5433_s5 = sld [smem:[#allocation56_spill]]  ;;  %s681_s17 = scalar_lea.vmem [#allocation13], %s4487_s20 }
  0xa8   : > { %s688_s23 = sshll.u32 %s681_s17, 4  ;;  %s5394_s3 = scalar_lea.sflag [#allocation14], %s4451_s16  ;;  %s4535_s23 = int_to_ptr.vmem [resolvable:$true] %s688_s23 }
  0xad   : > { %s4532_s27 = scalar_lea.hbm %s5433_s5, %s4490_s12  ;;  %s3698_s14 = scalar_lea.hbm %s5433_s5, 512 }
  0xae   : > { %s3694_s24 = scalar_lea.hbm %s4532_s27, 256  ;;  %p3699_p7 = scmp.lt.u32.totalorder %s4532_s27, %s5433_s5 }
  0xaf   : > { %p3695_p1 = scmp.ne.s32.totalorder %s4532_s27, %s3694_s24  ;;  %p3700_p9 = scmp.lt.u32.totalorder %s3698_s14, %s3694_s24 }
  0xb0   : > { %p3702_p13 = scmp.lt.u32.totalorder %s3694_s24, %s4532_s27 }
  0xb1   : > { %p3696_p4 = pnand %p3695_p1, %p5430_p0  ;;  %p3701_p11 = por %p3700_p9, %p3699_p7 }
  0xb3   : > { %p3697_p6 = pneg %p3696_p4  ;;  %p3703_p12 = por %p3702_p13, %p3701_p11 }
  0xb5   : > { %p3704_p3 = pnand %p3703_p12, %p3697_p6 }
  0xb7   : > { %3707 = shalt.err (!%p3704_p3)
}
  0xb8   : > { %s3708_s17 = scalar_lea.vmem %s4535_s23, 256  ;;  %s4212_s2 = smov [#allocation13]  }
  0xb9   : > { %p3709_p8 = scmp.ne.s32.totalorder %s4535_s23, %s3708_s17  ;;  %s3712_s21 = sshll.u32 %s4212_s2, 4  ;;  %s3713_s21 = int_to_ptr.vmem [resolvable:$false] %s3712_s21 }
  0xba   : > { %s3714_s30 = scalar_lea.vmem %s3713_s21, 512  ;;  %p3715_p2 = scmp.lt.s32.totalorder %s4535_s23, %s3713_s21 }
  0xbb   : > { %p3710_p5 = pnand %p3709_p8, %p5430_p0  ;;  %p3716_p1 = scmp.lt.s32.totalorder %s3714_s30, %s3708_s17 }
  0xbd   : > { %p3711_p10 = pneg %p3710_p5  ;;  %p3717_p4 = por %p3716_p1, %p3715_p2 }
  0xbf   : > { %p3718_p7 = pnand %p3717_p4, %p3711_p10 }
  0xc1   : > { %3721 = shalt.err (!%p3718_p7)
}
  0xc2   : > { %3403 = dma.hbm_to_vmem [thread:$0]  (%p5430_p0), %s4532_s27, 256, %s4535_s23, %s5394_s3, %s5395_s25, %s5395_s25, %s5399_s26  }
  0xc3   : > { %s5434_s7 = sld [smem:[#allocation57_spill]]  ;;  %s718_s17 = scalar_lea.vmem [#allocation16], %s4454_s18 }
  0xc4   : > { %s725_s2 = sshll.u32 %s718_s17, 4  ;;  %s5397_s21 = scalar_lea.sflag [#allocation17], %s4451_s16  ;;  %s726_s2 = int_to_ptr.vmem [resolvable:$true] %s725_s2 }
  0xc9   : > { %s4568_s1 = scalar_lea.hbm %s5434_s7, %s4457_s28  ;;  %s3726_s23 = scalar_lea.hbm %s5434_s7, 32 }
  0xca   : > { %s3722_s30 = scalar_lea.hbm %s4568_s1, 16  ;;  %p3727_p13 = scmp.lt.u32.totalorder %s4568_s1, %s5434_s7 }
  0xcb   : > { %p3723_p6 = scmp.ne.s32.totalorder %s4568_s1, %s3722_s30  ;;  %p3728_p12 = scmp.lt.u32.totalorder %s3726_s23, %s3722_s30 }
  0xcc   : > { %p3730_p8 = scmp.lt.u32.totalorder %s3722_s30, %s4568_s1 }
  0xcd   : > { %p3724_p9 = pnand %p3723_p6, %p5430_p0  ;;  %p3729_p3 = por %p3728_p12, %p3727_p13 }
  0xcf   : > { %p3725_p11 = pneg %p3724_p9  ;;  %p3731_p5 = por %p3730_p8, %p3729_p3 }
  0xd1   : > { %p3732_p10 = pnand %p3731_p5, %p3725_p11 }
  0xd3   : > { %3735 = shalt.err (!%p3732_p10)
}
  0xd4   : > { %s3736_s17 = scalar_lea.vmem %s726_s2, 16  ;;  %s4213_s3 = smov [#allocation16]  }
  0xd5   : > { %p3737_p2 = scmp.ne.s32.totalorder %s726_s2, %s3736_s17  ;;  %s3740_s25 = sshll.u32 %s4213_s3, 4  ;;  %s3741_s25 = int_to_ptr.vmem [resolvable:$false] %s3740_s25 }
  0xd6   : > { %s3742_s5 = scalar_lea.vmem %s3741_s25, 32  ;;  %p3743_p7 = scmp.lt.s32.totalorder %s726_s2, %s3741_s25 }
  0xd7   : > { %p3738_p1 = pnand %p3737_p2, %p5430_p0  ;;  %p3744_p6 = scmp.lt.s32.totalorder %s3742_s5, %s3736_s17 }
  0xd9   : > { %p3739_p4 = pneg %p3738_p1  ;;  %p3745_p9 = por %p3744_p6, %p3743_p7 }
  0xdb   : > { %p3746_p12 = pnand %p3745_p9, %p3739_p4 }
  0xdd   : > { %3749 = shalt.err (!%p3746_p12)
}
  0xde   : > { %3405 = dma.hbm_to_vmem [thread:$0]  (%p5430_p0), %s4568_s1, 16, %s726_s2, %s5397_s21  }
  0xdf   : > { %s4595_s3 = scalar_lea.hbm %s5362_s9, %s4490_s12  ;;  %s753_s25 = scalar_lea.vmem [#allocation19], %s4487_s20 }
  0xe0   : > { %s760_s23 = sshll.u32 %s753_s25, 4  ;;  %s5398_s24 = scalar_lea.sflag [#allocation20], %s4451_s16  ;;  %s4598_s23 = int_to_ptr.vmem [resolvable:$true] %s760_s23 }
  0xe1   : > { %s3750_s14 = scalar_lea.hbm %s4595_s3, 256  ;;  %s3754_s17 = scalar_lea.hbm %s5362_s9, 512 }
  0xe2   : > { %p3751_p11 = scmp.ne.s32.totalorder %s4595_s3, %s3750_s14  ;;  %p3755_p8 = scmp.lt.u32.totalorder %s4595_s3, %s5362_s9 }
  0xe3   : > { %p3756_p5 = scmp.lt.u32.totalorder %s3754_s17, %s3750_s14  ;;  %p3758_p2 = scmp.lt.u32.totalorder %s3750_s14, %s4595_s3 }
  0xe4   : > { %p3752_p13 = pnand %p3751_p11, %p5430_p0 }
  0xe5   : > { %p3757_p10 = por %p3756_p5, %p3755_p8 }
  0xe6   : > { %p3753_p3 = pneg %p3752_p13 }
  0xe7   : > { %p3759_p1 = por %p3758_p2, %p3757_p10 }
  0xe9   : > { %p3760_p4 = pnand %p3759_p1, %p3753_p3 }
  0xeb   : > { %3763 = shalt.err (!%p3760_p4)
}
  0xec   : > { %s3764_s27 = scalar_lea.vmem %s4598_s23, 256  ;;  %s4214_s25 = smov [#allocation19]  }
  0xed   : > { %p3765_p7 = scmp.ne.s32.totalorder %s4598_s23, %s3764_s27  ;;  %s3768_s1 = sshll.u32 %s4214_s25, 4  ;;  %s3769_s1 = int_to_ptr.vmem [resolvable:$false] %s3768_s1 }
  0xee   : > { %s3770_s2 = scalar_lea.vmem %s3769_s1, 512  ;;  %p3771_p12 = scmp.lt.s32.totalorder %s4598_s23, %s3769_s1 }
  0xef   : > { %p3766_p6 = pnand %p3765_p7, %p5430_p0  ;;  %p3772_p11 = scmp.lt.s32.totalorder %s3770_s2, %s3764_s27 }
  0xf1   : > { %p3767_p9 = pneg %p3766_p6  ;;  %p3773_p13 = por %p3772_p11, %p3771_p12 }
  0xf3   : > { %p3774_p8 = pnand %p3773_p13, %p3767_p9 }
  0xf5   : > { %3777 = shalt.err (!%p3774_p8)
}
  0xf6   : > { %s5435_s14 = smov 64   ;;  %s4631_s30 = scalar_lea.hbm %s5364_s11, %s4457_s28 }
  0xf7   : > { %3407 = dma.hbm_to_vmem [thread:$0]  (%p5430_p0), %s4595_s3, 256, %s4598_s23, %s5398_s24, %s5435_s14, %s5435_s14, %s5399_s26  }
  0xf8   : > { %s790_s27 = scalar_lea.vmem [#allocation22], %s4454_s18  ;;  %s5401_s1 = scalar_lea.sflag [#allocation23], %s4451_s16 }
  0xf9   : > { %s797_s25 = sshll.u32 %s790_s27, 4  ;;  %s3778_s2 = scalar_lea.hbm %s4631_s30, 16  ;;  %s798_s25 = int_to_ptr.vmem [resolvable:$true] %s797_s25 }
  0xfa   : > { %p3779_p3 = scmp.ne.s32.totalorder %s4631_s30, %s3778_s2  ;;  %s3782_s23 = scalar_lea.hbm %s5364_s11, 32 }
  0xfb   : > { %p3783_p2 = scmp.lt.u32.totalorder %s4631_s30, %s5364_s11  ;;  %p3784_p1 = scmp.lt.u32.totalorder %s3782_s23, %s3778_s2 }
  0xfc   : > { %p3780_p5 = pnand %p3779_p3, %p5430_p0  ;;  %p3786_p7 = scmp.lt.u32.totalorder %s3778_s2, %s4631_s30 }
  0xfd   : > { %p3785_p4 = por %p3784_p1, %p3783_p2 }
  0xfe   : > { %p3781_p10 = pneg %p3780_p5 }
  0xff   : > { %p3787_p6 = por %p3786_p7, %p3785_p4 }
 0x101   : > { %p3788_p9 = pnand %p3787_p6, %p3781_p10 }
 0x103   : > { %3791 = shalt.err (!%p3788_p9)
}
 0x104   : > { %s3792_s27 = scalar_lea.vmem %s798_s25, 16  ;;  %s4215_s24 = smov [#allocation22]  }
 0x105   : > { %p3793_p12 = scmp.ne.s32.totalorder %s798_s25, %s3792_s27  ;;  %s3796_s26 = sshll.u32 %s4215_s24, 4  ;;  %s3797_s26 = int_to_ptr.vmem [resolvable:$false] %s3796_s26 }
 0x106   : > { %s3798_s21 = scalar_lea.vmem %s3797_s26, 32  ;;  %p3799_p8 = scmp.lt.s32.totalorder %s798_s25, %s3797_s26 }
 0x107   : > { %p3794_p11 = pnand %p3793_p12, %p5430_p0  ;;  %p3800_p3 = scmp.lt.s32.totalorder %s3798_s21, %s3792_s27 }
 0x109   : > { %p3795_p13 = pneg %p3794_p11  ;;  %p3801_p5 = por %p3800_p3, %p3799_p8 }
 0x10b   : > { %p3802_p1 = pnand %p3801_p5, %p3795_p13 }
 0x10d   : > { %3805 = shalt.err (!%p3802_p1)
}
 0x10e   : > { %3409 = dma.hbm_to_vmem [thread:$0]  (%p5430_p0), %s4631_s30, 16, %s798_s25, %s5401_s1  }
 0x10f   : > { %s4658_s3 = scalar_lea.hbm %s5366_s13, %s4490_s12  ;;  %s825_s26 = scalar_lea.vmem [#allocation25], %s4487_s20 }
 0x110   : > { %s832_s23 = sshll.u32 %s825_s26, 4  ;;  %s3101_s17 = sshll.u32 %s4454_s18, 6  ;;  %s4661_s23 = int_to_ptr.vmem [resolvable:$true] %s832_s23 }
 0x111   : > { %s5402_s5 = scalar_lea.sflag [#allocation26], %s4451_s16  ;;  %s3806_s27 = scalar_lea.hbm %s4658_s3, 256 }
 0x112   : > { %p3807_p10 = scmp.ne.s32.totalorder %s4658_s3, %s3806_s27  ;;  %s3810_s21 = scalar_lea.hbm %s5366_s13, 512 }
 0x113   : > { %p3811_p7 = scmp.lt.u32.totalorder %s4658_s3, %s5366_s13  ;;  %p3812_p6 = scmp.lt.u32.totalorder %s3810_s21, %s3806_s27 }
 0x114   : > { %p3808_p2 = pnand %p3807_p10, %p5430_p0  ;;  %p3814_p12 = scmp.lt.u32.totalorder %s3806_s27, %s4658_s3 }
 0x115   : > { %p3813_p9 = por %p3812_p6, %p3811_p7 }
 0x116   : > { %p3809_p4 = pneg %p3808_p2 }
 0x117   : > { %p3815_p11 = por %p3814_p12, %p3813_p9 }
 0x119   : > { %p3816_p13 = pnand %p3815_p11, %p3809_p4 }
 0x11b   : > { %3819 = shalt.err (!%p3816_p13)
}
 0x11c   : > { %s3820_s26 = scalar_lea.vmem %s4661_s23, 256  ;;  %s4216_s30 = smov [#allocation25]  }
 0x11d   : > { %p3821_p8 = scmp.ne.s32.totalorder %s4661_s23, %s3820_s26  ;;  %s3824_s25 = sshll.u32 %s4216_s30, 4  ;;  %s3825_s25 = int_to_ptr.vmem [resolvable:$false] %s3824_s25 }
 0x11e   : > { %s3826_s2 = scalar_lea.vmem %s3825_s25, 512  ;;  %p3827_p1 = scmp.lt.s32.totalorder %s4661_s23, %s3825_s25 }
 0x11f   : > { %p3822_p3 = pnand %p3821_p8, %p5430_p0  ;;  %p3828_p10 = scmp.lt.s32.totalorder %s3826_s2, %s3820_s26 }
 0x121   : > { %p3823_p5 = pneg %p3822_p3  ;;  %p3829_p2 = por %p3828_p10, %p3827_p1 }
 0x123   : > { %p3830_p7 = pnand %p3829_p2, %p3823_p5 }
 0x125   : > { %3833 = shalt.err (!%p3830_p7)
}
 0x126   : > { %s5436_s27 = smov 4   ;;  %s3179_s21 = sshll.u32 %s4198_s0, 10 }
 0x127   : > { %3411 = dma.hbm_to_vmem [thread:$0]  (%p5430_p0), %s4658_s3, 256, %s4661_s23, %s5402_s5, %s5435_s14, %s5435_s14, %s5436_s27  }
 0x128   : > { %s4695_s30 = scalar_lea.hbm %s5368_s15, %s3179_s21  ;;  %s863_s25 = scalar_lea.vmem [#allocation28], %s3101_s17 }
 0x129   : > { %s870_s2 = sshll.u32 %s863_s25, 4  ;;  %s5403_s1 = scalar_lea.sflag [#allocation29], %s4451_s16  ;;  %s4699_s2 = int_to_ptr.vmem [resolvable:$true] %s870_s2 }
 0x12a   : > { %s3834_s7 = scalar_lea.hbm %s4695_s30, 1024  ;;  %s3838_s21 = scalar_lea.hbm %s5368_s15, 2048 }
 0x12b   : > { %p3835_p4 = scmp.ne.s32.totalorder %s4695_s30, %s3834_s7  ;;  %p3839_p12 = scmp.lt.u32.totalorder %s4695_s30, %s5368_s15 }
 0x12c   : > { %p3840_p11 = scmp.lt.u32.totalorder %s3838_s21, %s3834_s7  ;;  %p3842_p8 = scmp.lt.u32.totalorder %s3834_s7, %s4695_s30 }
 0x12d   : > { %p3836_p6 = pnand %p3835_p4, %p5430_p0 }
 0x12e   : > { %p3841_p13 = por %p3840_p11, %p3839_p12 }
 0x12f   : > { %p3837_p9 = pneg %p3836_p6 }
 0x130   : > { %p3843_p3 = por %p3842_p8, %p3841_p13 }
 0x132   : > { %p3844_p5 = pnand %p3843_p3, %p3837_p9 }
 0x134   : > { %3847 = shalt.err (!%p3844_p5)
}
 0x135   : > { %s3848_s17 = scalar_lea.vmem %s4699_s2, 1024  ;;  %s4217_s25 = smov [#allocation28]  }
 0x136   : > { %p3849_p1 = scmp.ne.s32.totalorder %s4699_s2, %s3848_s17  ;;  %s3852_s3 = sshll.u32 %s4217_s25, 4  ;;  %s3853_s3 = int_to_ptr.vmem [resolvable:$false] %s3852_s3 }
 0x137   : > { %s3854_s23 = scalar_lea.vmem %s3853_s3, 2048  ;;  %p3855_p7 = scmp.lt.s32.totalorder %s4699_s2, %s3853_s3 }
 0x138   : > { %p3850_p10 = pnand %p3849_p1, %p5430_p0  ;;  %p3856_p4 = scmp.lt.s32.totalorder %s3854_s23, %s3848_s17 }
 0x13a   : > { %p3851_p2 = pneg %p3850_p10  ;;  %p3857_p6 = por %p3856_p4, %p3855_p7 }
 0x13c   : > { %p3858_p12 = pnand %p3857_p6, %p3851_p2 }
 0x13e   : > { %3861 = shalt.err (!%p3858_p12)
}
 0x13f   : > { %3413 = dma.hbm_to_vmem [thread:$0]  (%p5430_p0), %s4695_s30, 1024, %s4699_s2, %s5403_s1, %s5435_s14, %s5435_s14, %s5436_s27  }
 0x140   : > { %s5437_s24 = sld [smem:[#allocation54_spill]]  ;;  %s621_s17 = scalar_lea.vmem [#allocation9], %s4454_s18 }
 0x141   : > { %s628_s25 = sshll.u32 %s621_s17, 4  ;;  %s629_s25 = int_to_ptr.vmem [resolvable:$true] %s628_s25 }
 0x146   : > { %s4732_s26 = scalar_lea.hbm %s5437_s24, %s4457_s28  ;;  %s3866_s30 = scalar_lea.hbm %s5437_s24, 32 }
 0x147   : > { %s3862_s3 = scalar_lea.hbm %s4732_s26, 16  ;;  %p3867_p8 = scmp.lt.u32.totalorder %s4732_s26, %s5437_s24 }
 0x148   : > { %p3863_p9 = scmp.ne.s32.totalorder %s4732_s26, %s3862_s3  ;;  %p3868_p3 = scmp.lt.u32.totalorder %s3866_s30, %s3862_s3 }
 0x149   : > { %p3870_p1 = scmp.lt.u32.totalorder %s3862_s3, %s4732_s26 }
 0x14a   : > { %p3864_p11 = pnand %p3863_p9, %p5430_p0  ;;  %p3869_p5 = por %p3868_p3, %p3867_p8 }
 0x14c   : > { %p3865_p13 = pneg %p3864_p11  ;;  %p3871_p10 = por %p3870_p1, %p3869_p5 }
 0x14e   : > { %p3872_p2 = pnand %p3871_p10, %p3865_p13 }
 0x150   : > { %3875 = shalt.err (!%p3872_p2)
}
 0x151   : > { %s3876_s21 = scalar_lea.vmem %s629_s25, 16  ;;  %s4218_s17 = smov [#allocation9]  }
 0x152   : > { %p3877_p7 = scmp.ne.s32.totalorder %s629_s25, %s3876_s21  ;;  %s3880_s1 = sshll.u32 %s4218_s17, 4  ;;  %s3881_s1 = int_to_ptr.vmem [resolvable:$false] %s3880_s1 }
 0x153   : > { %s3882_s5 = scalar_lea.vmem %s3881_s1, 32  ;;  %p3883_p12 = scmp.lt.s32.totalorder %s629_s25, %s3881_s1 }
 0x154   : > { %p3878_p4 = pnand %p3877_p7, %p5430_p0  ;;  %p3884_p9 = scmp.lt.s32.totalorder %s3882_s5, %s3876_s21 }
 0x156   : > { %p3879_p6 = pneg %p3878_p4  ;;  %p3885_p11 = por %p3884_p9, %p3883_p12 }
 0x158   : > { %p3886_p3 = pnand %p3885_p11, %p3879_p6 }
 0x15a   : > { %3889 = shalt.err (!%p3886_p3)
}
 0x15b   : > { %s5438_s3 = scalar_lea.sflag [#allocation8], %s4451_s16  ;;  %s4758_s2 = scalar_lea.hbm %s5357_s4, %s4490_s12 }
 0x15c   : > { %3400 = dma.hbm_to_vmem [thread:$0]  (%p5430_p0), %s4732_s26, 16, %s629_s25, %s5438_s3  }
 0x15d   : > { %s660_s1 = scalar_lea.vmem [#allocation12], %s4487_s20  ;;  %s3890_s21 = scalar_lea.hbm %s4758_s2, 256 }
 0x15e   : > { %s667_s7 = sshll.u32 %s660_s1, 4  ;;  %p3891_p13 = scmp.ne.s32.totalorder %s4758_s2, %s3890_s21  ;;  %s4761_s7 = int_to_ptr.vmem [resolvable:$true] %s667_s7 }
 0x15f   : > { %s3894_s25 = scalar_lea.hbm %s5357_s4, 512  ;;  %p3895_p1 = scmp.lt.u32.totalorder %s4758_s2, %s5357_s4 }
 0x160   : > { %p3892_p8 = pnand %p3891_p13, %p5430_p0  ;;  %p3896_p10 = scmp.lt.u32.totalorder %s3894_s25, %s3890_s21 }
 0x161   : > { %p3898_p7 = scmp.lt.u32.totalorder %s3890_s21, %s4758_s2 }
 0x162   : > { %p3893_p5 = pneg %p3892_p8  ;;  %p3897_p2 = por %p3896_p10, %p3895_p1 }
 0x164   : > { %p3899_p4 = por %p3898_p7, %p3897_p2 }
 0x166   : > { %p3900_p6 = pnand %p3899_p4, %p3893_p5 }
 0x168   : > { %3903 = shalt.err (!%p3900_p6)
}
 0x169   : > { %s3904_s20 = scalar_lea.vmem %s4761_s7, 256  ;;  %s4219_s3 = smov [#allocation12]  }
 0x16a   : > { %p3905_p12 = scmp.ne.s32.totalorder %s4761_s7, %s3904_s20  ;;  %s3908_s23 = sshll.u32 %s4219_s3, 4  ;;  %s3909_s23 = int_to_ptr.vmem [resolvable:$false] %s3908_s23 }
 0x16b   : > { %s3910_s30 = scalar_lea.vmem %s3909_s23, 512  ;;  %p3911_p3 = scmp.lt.s32.totalorder %s4761_s7, %s3909_s23 }
 0x16c   : > { %p3906_p9 = pnand %p3905_p12, %p5430_p0  ;;  %p3912_p13 = scmp.lt.s32.totalorder %s3910_s30, %s3904_s20 }
 0x16e   : > { %p3907_p11 = pneg %p3906_p9  ;;  %p3913_p8 = por %p3912_p13, %p3911_p3 }
 0x170   : > { %p3914_p1 = pnand %p3913_p8, %p3907_p11 }
 0x172   : > { %3917 = shalt.err (!%p3914_p1)
}
 0x173   : > { %s5439_s1 = scalar_lea.sflag [#allocation11], %s4451_s16  ;;  %s4793_s26 = scalar_lea.hbm %s5359_s6, %s4457_s28 }
 0x174   : > { %3402 = dma.hbm_to_vmem [thread:$0]  (%p5430_p0), %s4758_s2, 256, %s4761_s7, %s5439_s1, %s5435_s14, %s5435_s14, %s5436_s27  }
 0x175   : > { %s701_s25 = scalar_lea.vmem [#allocation15], %s4454_s18  ;;  %s3918_s12 = scalar_lea.hbm %s4793_s26, 16 }
 0x176   : > { %s708_s5 = sshll.u32 %s701_s25, 4  ;;  %p3919_p5 = scmp.ne.s32.totalorder %s4793_s26, %s3918_s12  ;;  %s709_s5 = int_to_ptr.vmem [resolvable:$true] %s708_s5 }
 0x177   : > { %s3922_s14 = scalar_lea.hbm %s5359_s6, 32  ;;  %p3923_p7 = scmp.lt.u32.totalorder %s4793_s26, %s5359_s6 }
 0x178   : > { %p3920_p10 = pnand %p3919_p5, %p5430_p0  ;;  %p3924_p4 = scmp.lt.u32.totalorder %s3922_s14, %s3918_s12 }
 0x179   : > { %p3926_p12 = scmp.lt.u32.totalorder %s3918_s12, %s4793_s26 }
 0x17a   : > { %p3921_p2 = pneg %p3920_p10  ;;  %p3925_p6 = por %p3924_p4, %p3923_p7 }
 0x17c   : > { %p3927_p9 = por %p3926_p12, %p3925_p6 }
 0x17e   : > { %p3928_p11 = pnand %p3927_p9, %p3921_p2 }
 0x180   : > { %3931 = shalt.err (!%p3928_p11)
}
 0x181   : > { %s3932_s7 = scalar_lea.vmem %s709_s5, 16  ;;  %s4220_s23 = smov [#allocation15]  }
 0x182   : > { %p3933_p3 = scmp.ne.s32.totalorder %s709_s5, %s3932_s7  ;;  %s3936_s30 = sshll.u32 %s4220_s23, 4  ;;  %s3937_s30 = int_to_ptr.vmem [resolvable:$false] %s3936_s30 }
 0x183   : > { %s3938_s1 = scalar_lea.vmem %s3937_s30, 32  ;;  %p3939_p1 = scmp.lt.s32.totalorder %s709_s5, %s3937_s30 }
 0x184   : > { %p3934_p13 = pnand %p3933_p3, %p5430_p0  ;;  %p3940_p5 = scmp.lt.s32.totalorder %s3938_s1, %s3932_s7 }
 0x186   : > { %p3935_p8 = pneg %p3934_p13  ;;  %p3941_p10 = por %p3940_p5, %p3939_p1 }
 0x188   : > { %p3942_p4 = pnand %p3941_p10, %p3935_p8 }
 0x18a   : > { %3945 = shalt.err (!%p3942_p4)
}
 0x18b   : > { %s5440_s21 = scalar_lea.sflag [#allocation14], %s4451_s16  ;;  %s4819_s12 = scalar_lea.hbm %s5361_s8, %s4457_s28 }
 0x18c   : > { %3404 = dma.hbm_to_vmem [thread:$0]  (%p5430_p0), %s4793_s26, 16, %s709_s5, %s5440_s21  }
 0x18d   : > { %s735_s20 = scalar_lea.vmem [#allocation18], %s4454_s18  ;;  %s3946_s14 = scalar_lea.hbm %s4819_s12, 16 }
 0x18e   : > { %s742_s3 = sshll.u32 %s735_s20, 4  ;;  %p3947_p2 = scmp.ne.s32.totalorder %s4819_s12, %s3946_s14  ;;  %s743_s3 = int_to_ptr.vmem [resolvable:$true] %s742_s3 }
 0x18f   : > { %s3950_s26 = scalar_lea.hbm %s5361_s8, 32  ;;  %p3951_p12 = scmp.lt.u32.totalorder %s4819_s12, %s5361_s8 }
 0x190   : > { %p3948_p7 = pnand %p3947_p2, %p5430_p0  ;;  %p3952_p9 = scmp.lt.u32.totalorder %s3950_s26, %s3946_s14 }
 0x191   : > { %p3954_p3 = scmp.lt.u32.totalorder %s3946_s14, %s4819_s12 }
 0x192   : > { %p3949_p6 = pneg %p3948_p7  ;;  %p3953_p11 = por %p3952_p9, %p3951_p12 }
 0x194   : > { %p3955_p13 = por %p3954_p3, %p3953_p11 }
 0x196   : > { %p3956_p8 = pnand %p3955_p13, %p3949_p6 }
 0x198   : > { %3959 = shalt.err (!%p3956_p8)
}
 0x199   : > { %s3960_s23 = scalar_lea.vmem %s743_s3, 16  ;;  %s4221_s30 = smov [#allocation18]  }
 0x19a   : > { %p3961_p1 = scmp.ne.s32.totalorder %s743_s3, %s3960_s23  ;;  %s3964_s1 = sshll.u32 %s4221_s30, 4  ;;  %s3965_s1 = int_to_ptr.vmem [resolvable:$false] %s3964_s1 }
 0x19b   : > { %s3966_s21 = scalar_lea.vmem %s3965_s1, 32  ;;  %p3967_p4 = scmp.lt.s32.totalorder %s743_s3, %s3965_s1 }
 0x19c   : > { %p3962_p5 = pnand %p3961_p1, %p5430_p0  ;;  %p3968_p2 = scmp.lt.s32.totalorder %s3966_s21, %s3960_s23 }
 0x19e   : > { %p3963_p10 = pneg %p3962_p5  ;;  %p3969_p7 = por %p3968_p2, %p3967_p4 }
 0x1a0   : > { %p3970_p9 = pnand %p3969_p7, %p3963_p10 }
 0x1a2   : > { %3973 = shalt.err (!%p3970_p9)
}
 0x1a3   : > { %s5441_s17 = scalar_lea.sflag [#allocation17], %s4451_s16  ;;  %s4845_s14 = scalar_lea.hbm %s5363_s10, %s4457_s28 }
 0x1a4   : > { %3406 = dma.hbm_to_vmem [thread:$0]  (%p5430_p0), %s4819_s12, 16, %s743_s3, %s5441_s17  }
 0x1a5   : > { %s773_s27 = scalar_lea.vmem [#allocation21], %s4454_s18  ;;  %s3974_s26 = scalar_lea.hbm %s4845_s14, 16 }
 0x1a6   : > { %s780_s2 = sshll.u32 %s773_s27, 4  ;;  %p3975_p6 = scmp.ne.s32.totalorder %s4845_s14, %s3974_s26  ;;  %s781_s2 = int_to_ptr.vmem [resolvable:$true] %s780_s2 }
 0x1a7   : > { %s3978_s12 = scalar_lea.hbm %s5363_s10, 32  ;;  %p3979_p3 = scmp.lt.u32.totalorder %s4845_s14, %s5363_s10 }
 0x1a8   : > { %p3976_p12 = pnand %p3975_p6, %p5430_p0  ;;  %p3980_p13 = scmp.lt.u32.totalorder %s3978_s12, %s3974_s26 }
 0x1a9   : > { %p3982_p1 = scmp.lt.u32.totalorder %s3974_s26, %s4845_s14 }
 0x1aa   : > { %p3977_p11 = pneg %p3976_p12  ;;  %p3981_p8 = por %p3980_p13, %p3979_p3 }
 0x1ac   : > { %p3983_p5 = por %p3982_p1, %p3981_p8 }
 0x1ae   : > { %p3984_p10 = pnand %p3983_p5, %p3977_p11 }
 0x1b0   : > { %3987 = shalt.err (!%p3984_p10)
}
 0x1b1   : > { %s3988_s30 = scalar_lea.vmem %s781_s2, 16  ;;  %s4222_s1 = smov [#allocation21]  }
 0x1b2   : > { %p3989_p4 = scmp.ne.s32.totalorder %s781_s2, %s3988_s30  ;;  %s3992_s21 = sshll.u32 %s4222_s1, 4  ;;  %s3993_s21 = int_to_ptr.vmem [resolvable:$false] %s3992_s21 }
 0x1b3   : > { %s3994_s17 = scalar_lea.vmem %s3993_s21, 32  ;;  %p3995_p9 = scmp.lt.s32.totalorder %s781_s2, %s3993_s21 }
 0x1b4   : > { %p3990_p2 = pnand %p3989_p4, %p5430_p0  ;;  %p3996_p6 = scmp.lt.s32.totalorder %s3994_s17, %s3988_s30 }
 0x1b6   : > { %p3991_p7 = pneg %p3990_p2  ;;  %p3997_p12 = por %p3996_p6, %p3995_p9 }
 0x1b8   : > { %p3998_p3 = pnand %p3997_p12, %p3991_p7 }
 0x1ba   : > { %4001 = shalt.err (!%p3998_p3)
}
 0x1bb   : > { %s5442_s25 = scalar_lea.sflag [#allocation20], %s4451_s16  ;;  %s5443_s26 = sld [smem:[#allocation58_spill]] }
 0x1bc   : > { %3408 = dma.hbm_to_vmem [thread:$0]  (%p5430_p0), %s4845_s14, 16, %s781_s2, %s5442_s25  }
 0x1bd   : > { %s807_s7 = scalar_lea.vmem [#allocation24], %s4454_s18 }
 0x1be   : > { %s814_s12 = sshll.u32 %s807_s7, 4  ;;  %s815_s12 = int_to_ptr.vmem [resolvable:$true] %s814_s12 }
 0x1c1   : > { %s4871_s5 = scalar_lea.hbm %s5443_s26, %s4457_s28  ;;  %s4006_s14 = scalar_lea.hbm %s5443_s26, 32 }
 0x1c2   : > { %s4002_s3 = scalar_lea.hbm %s4871_s5, 16  ;;  %p4007_p1 = scmp.lt.u32.totalorder %s4871_s5, %s5443_s26 }
 0x1c3   : > { %p4003_p11 = scmp.ne.s32.totalorder %s4871_s5, %s4002_s3  ;;  %p4008_p5 = scmp.lt.u32.totalorder %s4006_s14, %s4002_s3 }
 0x1c4   : > { %p4010_p4 = scmp.lt.u32.totalorder %s4002_s3, %s4871_s5 }
 0x1c5   : > { %p4004_p13 = pnand %p4003_p11, %p5430_p0  ;;  %p4009_p10 = por %p4008_p5, %p4007_p1 }
 0x1c7   : > { %p4005_p8 = pneg %p4004_p13  ;;  %p4011_p2 = por %p4010_p4, %p4009_p10 }
 0x1c9   : > { %p4012_p7 = pnand %p4011_p2, %p4005_p8 }
 0x1cb   : > { %4015 = shalt.err (!%p4012_p7)
}
 0x1cc   : > { %s4016_s21 = scalar_lea.vmem %s815_s12, 16  ;;  %s4223_s17 = smov [#allocation24]  }
 0x1cd   : > { %p4017_p9 = scmp.ne.s32.totalorder %s815_s12, %s4016_s21  ;;  %s4020_s25 = sshll.u32 %s4223_s17, 4  ;;  %s4021_s25 = int_to_ptr.vmem [resolvable:$false] %s4020_s25 }
 0x1ce   : > { %s4022_s20 = scalar_lea.vmem %s4021_s25, 32  ;;  %p4023_p3 = scmp.lt.s32.totalorder %s815_s12, %s4021_s25 }
 0x1cf   : > { %p4018_p6 = pnand %p4017_p9, %p5430_p0  ;;  %p4024_p11 = scmp.lt.s32.totalorder %s4022_s20, %s4016_s21 }
 0x1d1   : > { %p4019_p12 = pneg %p4018_p6  ;;  %p4025_p13 = por %p4024_p11, %p4023_p3 }
 0x1d3   : > { %p4026_p1 = pnand %p4025_p13, %p4019_p12 }
 0x1d5   : > { %4029 = shalt.err (!%p4026_p1)
}
 0x1d6   : > { %s5444_s27 = scalar_lea.sflag [#allocation23], %s4451_s16  ;;  %s5445_s23 = sld [smem:[#allocation59_spill]] }
 0x1d7   : > { %3410 = dma.hbm_to_vmem [thread:$0]  (%p5430_p0), %s4871_s5, 16, %s815_s12, %s5444_s27  }
 0x1d8   : > { %s845_s14 = scalar_lea.vmem [#allocation27], %s4454_s18 }
 0x1d9   : > { %s852_s2 = sshll.u32 %s845_s14, 4  ;;  %s853_s2 = int_to_ptr.vmem [resolvable:$true] %s852_s2 }
 0x1dc   : > { %s4897_s30 = scalar_lea.hbm %s5445_s23, %s4457_s28  ;;  %s4034_s5 = scalar_lea.hbm %s5445_s23, 32 }
 0x1dd   : > { %s4030_s1 = scalar_lea.hbm %s4897_s30, 16  ;;  %p4035_p4 = scmp.lt.u32.totalorder %s4897_s30, %s5445_s23 }
 0x1de   : > { %p4031_p8 = scmp.ne.s32.totalorder %s4897_s30, %s4030_s1  ;;  %p4036_p2 = scmp.lt.u32.totalorder %s4034_s5, %s4030_s1 }
 0x1df   : > { %p4038_p9 = scmp.lt.u32.totalorder %s4030_s1, %s4897_s30 }
 0x1e0   : > { %p4032_p5 = pnand %p4031_p8, %p5430_p0  ;;  %p4037_p7 = por %p4036_p2, %p4035_p4 }
 0x1e2   : > { %p4033_p10 = pneg %p4032_p5  ;;  %p4039_p6 = por %p4038_p9, %p4037_p7 }
 0x1e4   : > { %p4040_p12 = pnand %p4039_p6, %p4033_p10 }
 0x1e6   : > { %4043 = shalt.err (!%p4040_p12)
}
 0x1e7   : > { %s4044_s20 = scalar_lea.vmem %s853_s2, 16  ;;  %s4224_s27 = smov [#allocation27]  }
 0x1e8   : > { %p4045_p3 = scmp.ne.s32.totalorder %s853_s2, %s4044_s20  ;;  %s4048_s7 = sshll.u32 %s4224_s27, 4  ;;  %s4049_s7 = int_to_ptr.vmem [resolvable:$false] %s4048_s7 }
 0x1e9   : > { %s4050_s3 = scalar_lea.vmem %s4049_s7, 32  ;;  %p4051_p1 = scmp.lt.s32.totalorder %s853_s2, %s4049_s7 }
 0x1ea   : > { %p4046_p11 = pnand %p4045_p3, %p5430_p0  ;;  %p4052_p8 = scmp.lt.s32.totalorder %s4050_s3, %s4044_s20 }
 0x1ec   : > { %p4047_p13 = pneg %p4046_p11  ;;  %p4053_p5 = por %p4052_p8, %p4051_p1 }
 0x1ee   : > { %p4054_p2 = pnand %p4053_p5, %p4047_p13 }
 0x1f0   : > { %4057 = shalt.err (!%p4054_p2)
}
 0x1f1   : > { %s5446_s14 = scalar_lea.sflag [#allocation26], %s4451_s16  ;;  %s5447_s17 = sld [smem:[#allocation60_spill]] }
 0x1f2   : > { %3412 = dma.hbm_to_vmem [thread:$0]  (%p5430_p0), %s4897_s30, 16, %s853_s2, %s5446_s14  }
 0x1f3   : > { %s883_s12 = scalar_lea.vmem [#allocation30], %s4454_s18 }
 0x1f4   : > { %s890_s25 = sshll.u32 %s883_s12, 4  ;;  %s891_s25 = int_to_ptr.vmem [resolvable:$true] %s890_s25 }
 0x1f7   : > { %s4923_s5 = scalar_lea.hbm %s5447_s17, %s4457_s28  ;;  %s4062_s30 = scalar_lea.hbm %s5447_s17, 32 }
 0x1f8   : > { %s4058_s20 = scalar_lea.hbm %s4923_s5, 16  ;;  %p4063_p9 = scmp.lt.u32.totalorder %s4923_s5, %s5447_s17 }
 0x1f9   : > { %p4059_p10 = scmp.ne.s32.totalorder %s4923_s5, %s4058_s20  ;;  %p4064_p6 = scmp.lt.u32.totalorder %s4062_s30, %s4058_s20 }
 0x1fa   : > { %p4066_p3 = scmp.lt.u32.totalorder %s4058_s20, %s4923_s5 }
 0x1fb   : > { %p4060_p4 = pnand %p4059_p10, %p5430_p0  ;;  %p4065_p12 = por %p4064_p6, %p4063_p9 }
 0x1fd   : > { %p4061_p7 = pneg %p4060_p4  ;;  %p4067_p11 = por %p4066_p3, %p4065_p12 }
 0x1ff   : > { %p4068_p13 = pnand %p4067_p11, %p4061_p7 }
 0x201   : > { %4071 = shalt.err (!%p4068_p13)
}
 0x202   : > { %s4072_s18 = scalar_lea.vmem %s891_s25, 16  ;;  %s4225_s28 = smov [#allocation30]  }
 0x203   : > { %p4073_p1 = scmp.ne.s32.totalorder %s891_s25, %s4072_s18  ;;  %s4076_s14 = sshll.u32 %s4225_s28, 4  ;;  %s4077_s14 = int_to_ptr.vmem [resolvable:$false] %s4076_s14 }
 0x204   : > { %s4078_s1 = scalar_lea.vmem %s4077_s14, 32  ;;  %p4079_p2 = scmp.lt.s32.totalorder %s891_s25, %s4077_s14 }
 0x205   : > { %p4074_p8 = pnand %p4073_p1, %p5430_p0  ;;  %p4080_p10 = scmp.lt.s32.totalorder %s4078_s1, %s4072_s18 }
 0x207   : > { %p4075_p5 = pneg %p4074_p8  ;;  %p4081_p4 = por %p4080_p10, %p4079_p2 }
 0x209   : > { %p4082_p6 = pnand %p4081_p4, %p4075_p5 }
 0x20b   : > { %4085 = shalt.err (!%p4082_p6)
}
 0x20c   : > { %s5448_s21 = scalar_lea.sflag [#allocation29], %s4451_s16 }
 0x20d   : > { %3414 = dma.hbm_to_vmem [thread:$0]  (%p5430_p0), %s4923_s5, 16, %s891_s25, %s5448_s21  }
 0x20e PF: > { %s5449_s12 = sld [smem:[#allocation51_spill]] }
 0x214   : > { %p5450_p7 = scmp.ne.s32.totalorder %s5449_s12, 0 }
 0x215   : > { %s5451_s20 = sld [smem:[#allocation47_spill]] (!%p5450_p7) }
 0x216   : > { %899 = sbr.rel (%p5450_p7) target bundleno = 4679 (0x1247), region = 92 }
 0x21b   : > { %p5452_p9 = scmp.eq.s32.totalorder (!%p5450_p7), %s5451_s20, 0 }
 0x21d   : > { %4137 = dma.done.wait (%p5452_p9), [#allocation5], 256   ;;  %p5453_p12 = pmov %p5452_p9 }
 0x21e   : > { %s5454_s27 = sld [smem:[#allocation45_spill]]  ;;  %s5455_s7 = sld [smem:[#allocation49_spill]] }
 0x21f   : > { %4139 = vsyncadd (%p5453_p12), [#allocation5], 4294967040  ;;  %s4952_s30 = sand.u32 1, %s5451_s20  }
 0x220   : > { %s906_s16 = scalar_lea.sflag [#allocation8], %s4952_s30 }
 0x224   : > { %s4955_s22 = sand.u32 1, %s5454_s27   ;;  %p5456_p0 = scmp.ne.s32.totalorder %s5455_s7, 0 }
 0x225   : > { %s908_s5 = scalar_lea.vmem [#allocation7], %s4955_s22 }
 0x226   : > { %4141 = dma.done.wait (%p5456_p0), %s906_s16, 32  }
 0x227   : > { %4143 = vsyncadd (%p5456_p0), %s906_s16, 4294967264  ;;  %s4964_s25 = sshll.u32 %s4955_s22, 4  ;;  %s916_s2 = scalar_lea.vmem [#allocation9], %s4955_s22 }
 0x228   : > { %s922_s3 = scalar_lea.sflag [#allocation11], %s4952_s30  ;;  %s925_s18 = scalar_lea.vmem [#allocation10], %s4964_s25 }
 0x229   : > { %4145 = dma.done.wait (%p5456_p0), %s922_s3, 512  }
 0x22a   : > { %4147 = vsyncadd (%p5456_p0), %s922_s3, 4294966784  ;;  %s934_s28 = scalar_lea.vmem [#allocation12], %s4964_s25  ;;  %s940_s14 = scalar_lea.sflag [#allocation14], %s4952_s30 }
 0x22b   : > { %4149 = dma.done.wait (%p5456_p0), %s940_s14, 272  }
 0x22c   : > { %4151 = vsyncadd (%p5456_p0), %s940_s14, 4294967024  ;;  %s957_s12 = scalar_lea.sflag [#allocation17], %s4952_s30 }
 0x22d   : > { %4153 = dma.done.wait (%p5456_p0), %s957_s12, 32  }
 0x22e   : > { %4155 = vsyncadd (%p5456_p0), %s957_s12, 4294967264  ;;  %s973_s3 = scalar_lea.sflag [#allocation20], %s4952_s30 }
 0x22f   : > { %4157 = dma.done.wait (%p5456_p0), %s973_s3, 272  }
 0x230   : > { %4159 = vsyncadd (%p5456_p0), %s973_s3, 4294967024  ;;  %s990_s21 = scalar_lea.sflag [#allocation23], %s4952_s30 }
 0x231   : > { %4161 = dma.done.wait (%p5456_p0), %s990_s21, 32  }
 0x232   : > { %4163 = vsyncadd (%p5456_p0), %s990_s21, 4294967264  ;;  %s1006_s1 = scalar_lea.sflag [#allocation26], %s4952_s30  ;;  %s1009_s16 = scalar_lea.vmem [#allocation25], %s4964_s25 }
 0x233   : > { %4165 = dma.done.wait (%p5456_p0), %s1006_s1, 272  }
 0x234   : > { %4167 = vsyncadd (%p5456_p0), %s1006_s1, 4294967024  ;;  %s3112_s3 = sshll.u32 %s4955_s22, 6  ;;  %s1017_s27 = scalar_lea.vmem [#allocation27], %s4955_s22 }
 0x235   : > { %s1023_s14 = scalar_lea.sflag [#allocation29], %s4952_s30  ;;  %s5011_s21 = scalar_lea.vmem [#allocation28], %s3112_s3 }
 0x236   : > { %4169 = dma.done.wait (%p5456_p0), %s1023_s14, 1040  }
 0x237   : > { %4171 = vsyncadd (%p5456_p0), %s1023_s14, 4294966256  ;;  %s1034_s12 = scalar_lea.vmem [#allocation30], %s4955_s22  ;;  %p5457_p3 = pmov %p5452_p9 }
 0x239   : > { %4173 = dma.done.wait (%p5457_p3), [#allocation32], 128   ;;  %p5458_p11 = pmov %p5457_p3 }
 0x23a   : > { %s5459_s1 = sld [smem:[#allocation46_spill]] }
 0x23b   : > { %4175 = vsyncadd (%p5458_p11), [#allocation32], 4294967168 }
 0x240   : > { %p3114_p13 = scmp.ne.s32.totalorder %s5459_s1, 0 }
 0x241   : > { %v1158_v0 = vld [vmem:[#allocation4] sm:$0xff] (!%p3114_p13)  ;;  %vm1160_vm0 = vcmask (!%p3114_p13), 261120   ;;  %v1159_v1 = vld [vmem:[#allocation4 + $0x8] sm:$0xff] (!%p3114_p13) }
 0x242   : > { %1157 = sbr.rel (%p3114_p13) target bundleno = 585 (0x249), region = 168  ;;  %1161 = vst.msk [vmem:[#allocation2] sm:$0xff] (!%p3114_p13), %vm1160_vm0, %v1158_v0  ;;  %1162 = vst.msk [vmem:[#allocation2 + $0x8] sm:$0xff] (!%p3114_p13), %vm1160_vm0, %v1159_v1 }
 0x249 PF: > { %v5023_v2 = vld [vmem:[#allocation2] sm:$0xff]  ;;  %vm1168_vm1 = vcmask 261120   ;;  %v5025_v3 = vld [vmem:[#allocation2 + $0x8] sm:$0xff]  ;;  %v4226_v17 = vmov 0.0   ;;  %vm4227_vm2 = vmmov 0   ;;  %s5460_s20 = scalar_lea.vmem [#allocation13], %s4964_s25 }
 0x24a   : > { %v1169_v4 = vsel %vm1168_vm1, %v5023_v2, 0.0  ;;  %v1172_v5 = vsel %vm1168_vm1, %v5025_v3, 0.0  ;;  %v3516_v16 = vld [vmem:[%s925_s18] sm:$0xff]   ;;  %3239 = vmatprep.subr.bf16.mxu0 %v4226_v17  ;;  %3263 = vmatprep.subr.bf16.mxu1 %v4226_v17  ;;  %v3517_v18 = vld [vmem:[%s925_s18 + $0x8] sm:$0xff]   ;;  %s5461_s7 = smov %s5460_s20  ;;  %s5462_s30 = scalar_lea.vmem [#allocation16], %s4955_s22  ;;  %vm1420_vm3 = vcmask 64512  }
 0x24b   : > { %1170 = vadd.xlane.f32.xlu0 %v1169_v4  ;;  %3240 = vmatpush3.bf16.msra.mxu0 %v3516_v16  ;;  %v3115_v27 = vld [vmem:[%s908_s5] ss:$0 sm:$0xff]  ;;  %v3518_v35 = vld [vmem:[%s934_s28] sm:$0xff]   ;;  %s5463_s5 = scalar_lea.vmem [#allocation15], %s4955_s22  ;;  %vm1544_vm4 = vcmask 1043456   ;;  %s4228_s18 = smov 120  }
 0x24c   : > { %3243 = vmatprep.mubr.msk.bf16.mxu0 %vm4227_vm2, %v4226_v17  ;;  %3241 = vmatprep.subr.bf16.mxu0 %v4226_v17  ;;  %v3116_v31 = vld [vmem:[%s916_s2] ss:$0 sm:$0xff]  ;;  %v3520_v38 = vld [vmem:[%s5460_s20] sm:$0xff]   ;;  %s5464_s2 = scalar_lea.vmem [#allocation18], %s4955_s22  ;;  %s4230_s14 = smov 104   ;;  %vm1874_vm5 = vcmask 130112  }
 0x24d   : > { %3265 = vmatprep.mubr.msk.bf16.mxu1 %vm4227_vm2, %v4226_v17  ;;  %v3519_v37 = vld [vmem:[%s934_s28 + $0x8] sm:$0xff]   ;;  %s4229_s28 = smov 112   ;;  %s4231_s3 = smov 8   ;;  %vm2109_vm6 = vcmask 195712   ;;  %vm2344_vm7 = vcmask 261312  }
 0x24e   : > { %v3521_v39 = vld [vmem:[%s5461_s7 + $0x8] sm:$0xff]   ;;  %v3122_v44 = vld [vmem:[%s5462_s30] ss:$0 sm:$0xff]  ;;  %s4232_s1 = smov 16   ;;  %s5465_s20 = scalar_lea.vmem [#allocation19], %s4964_s25 }
 0x24f   : > { %1173 = vadd.xlane.f32.xlu0 %v1172_v5  ;;  %3242 = vmatpush3.bf16.msra.mxu0 %v3517_v18  ;;  %v3117_v52 = vld [vmem:[%s5463_s5] ss:$0 sm:$0xff]  ;;  %s5466_s7 = smov %s5465_s20  ;;  %s4233_s30 = smov 24  }
 0x250   : > { %3247 = vmatprep.subr.bf16.mxu0 %v4226_v17  ;;  %v3126_v55 = vld [vmem:[%s5464_s2] ss:$0 sm:$0xff]  ;;  %s5467_s5 = scalar_lea.vmem [#allocation21], %s4955_s22  ;;  %s5468_s2 = scalar_lea.vmem [#allocation22], %s4955_s22 }
 0x251   : > { %s5469_s25 = scalar_lea.vmem [#allocation24], %s4955_s22 }
 0x2d8   : > { %v1171_v6 = vpop.xlane.xlu0 %1170 }
 0x2d9   : > { %v1176_v7 = vmul.f32 0.03125, %v1171_v6 }
 0x2db   : > { %v1178_v8 = vsub.f32 %v5023_v2, %v1176_v7 }
 0x2dc   : > { %v1174_v9 = vpop.xlane.xlu0 %1173 }
 0x2dd   : > { %v1177_v10 = vmul.f32 0.03125, %v1174_v9  ;;  %v1180_v11 = vmul.f32 %v1178_v8, %v1178_v8 }
 0x2df   : > { %v1179_v12 = vsub.f32 %v5025_v3, %v1177_v10  ;;  %v1182_v13 = vsel %vm1168_vm1, %v1180_v11, 0.0  ;;  %v5110_v10 = vld [vmem:[#allocation31] sm:$0xff] }
 0x2e0   : > { %1183 = vadd.xlane.f32.xlu1 %v1182_v13 }
 0x2e1   : > { %v1181_v14 = vmul.f32 %v1179_v12, %v1179_v12 }
 0x2e3   : > { %v1185_v15 = vsel %vm1168_vm1, %v1181_v14, 0.0 }
 0x2e4   : > { %1186 = vadd.xlane.f32.xlu1 %v1185_v15 }
 0x36d   : > { %v1184_v19 = vpop.xlane.xlu1 %1183 }
 0x36e   : > { %v1188_v20 = vmul.f32 0.03125, %v1184_v19 }
 0x370   : > { %v1190_v21 = vadd.f32 1e-05, %v1188_v20 }
 0x371   : > { %v1187_v22 = vpop.xlane.xlu1 %1186 }
 0x372   : > { %3534 = vrsqrt.f32 %v1190_v21  ;;  %v1189_v23 = vmul.f32 0.03125, %v1187_v22 }
 0x374   : > { %v1191_v24 = vadd.f32 1e-05, %v1189_v23 }
 0x376   : > { %3536 = vrsqrt.f32 %v1191_v24 }
 0x37c   : > { %v3535_v25 = vpop.eup %3534 }
 0x37d   : > { %v1194_v26 = vmul.f32 %v3535_v25, %v1178_v8 }
 0x37f   : > { %v1202_v30 = vmul.f32 %v3115_v27, %v1194_v26 }
 0x380   : > { %v3537_v28 = vpop.eup %3536 }
 0x381   : > { %v1195_v29 = vmul.f32 %v3537_v28, %v1179_v12  ;;  %v1210_v33 = vadd.f32 %v3116_v31, %v1202_v30 }
 0x383   : > { %v1203_v32 = vmul.f32 %v3115_v27, %v1195_v29 }
 0x385   : > { %v1211_v34 = vadd.f32 %v3116_v31, %v1203_v32 }
 0x387   : > { %v3180_v36 = vpack.c.bf16 %v1211_v34, %v1210_v33 }
 0x389   : > { %3244 = vmatmul.mubr.msk.bf16.vlgmr.msra.gmra.mrb[0].mxu0 %vm1168_vm1, %v3180_v36 }
 0x38a   : > { %3248 = vmatpush3.bf16.msra.mxu0 %v3518_v35  ;;  %3251 = vmatprep.mubr.msk.bf16.mxu0 %vm4227_vm2, %v4226_v17 }
 0x38b   : > { %3249 = vmatprep.subr.bf16.mxu0 %v4226_v17 }
 0x38e   : > { %3250 = vmatpush3.bf16.msra.mxu0 %v3519_v37 }
 0x38f   : > { %3255 = vmatprep.subr.bf16.mxu0 %v4226_v17 }
 0x391   : > { %3252 = vmatmul.mubr.msk.bf16.vlgmr.msra.gmra.mrb[4].mxu0 %vm1168_vm1, %v3180_v36 }
 0x392   : > { %3256 = vmatpush3.bf16.msra.mxu0 %v3520_v38  ;;  %3259 = vmatprep.mubr.msk.bf16.mxu0 %vm4227_vm2, %v4226_v17 }
 0x393   : > { %3257 = vmatprep.subr.bf16.mxu0 %v4226_v17 }
 0x396   : > { %3258 = vmatpush3.bf16.msra.mxu0 %v3521_v39 }
 0x397   : > { %3269 = vmatprep.subr.bf16.mxu0 %v4226_v17 }
 0x399   : > { %3260 = vmatmul.mubr.msk.bf16.vlgmr.msra.gmra.mrb[8].mxu0 %vm1168_vm1, %v3180_v36 }
 0x39a   : > { %3271 = vmatprep.mubr.msk.bf16.mxu0 %vm4227_vm2, %v4226_v17 }
 0x45c   : > { %v1279_v40 = vpop.f32.mrb[0].mxu0 }
 0x45d   : > { %v3245_v41 = vpop.f32.mrb[1].mxu0  ;;  %v1280_v56 = vadd.f32 %v3117_v52, %v1279_v40 }
 0x45e   : > { %v1282_v42 = vpop.f32.mrb[2].mxu0 }
 0x45f   : > { %v3246_v43 = vpop.f32.mrb[3].mxu0  ;;  %v1283_v59 = vadd.f32 %v3117_v52, %v1282_v42  ;;  %v5088_v63 = vpack.c.bf16 %v1280_v56, %v1280_v56 }
 0x461   : > { %v5092_v5 = vpack.c.bf16 %v1283_v59, %v1283_v59 }
 0x464   : > { %v1343_v45 = vpop.f32.mrb[4].mxu0 }
 0x465   : > { %v1344_v46 = vadd.f32 %v3122_v44, %v1343_v45  ;;  %v3253_v47 = vpop.f32.mrb[5].mxu0 }
 0x466   : > { %v1346_v48 = vpop.f32.mrb[6].mxu0 }
 0x467   : > { %v5074_v49 = vpack.c.bf16 %v1344_v46, %v1344_v46  ;;  %v1347_v50 = vadd.f32 %v3122_v44, %v1346_v48  ;;  %v3254_v51 = vpop.f32.mrb[7].mxu0 }
 0x469   : > { %v5078_v53 = vpack.c.bf16 %v1347_v50, %v1347_v50  ;;  %v1425_v54 = vsel %vm1420_vm3, %v5074_v49, 0 }
 0x46a   : > { %3264 = vmatpush3.bf16.xpose.msra.mxu1 %v1425_v54 }
 0x46b   : > { %v1471_v57 = vsel %vm1420_vm3, %v5078_v53, 0  ;;  %3275 = vmatprep.subr.bf16.mxu1 %v4226_v17 }
 0x46c   : > { %v1407_v58 = vpop.f32.mrb[8].mxu0  ;;  %3270 = vmatpush3.bf16.xpose.msra.mxu0 %v1471_v57 }
 0x46d   : > { %v1408_v60 = vadd.f32 %v3126_v55, %v1407_v58  ;;  %v3261_v61 = vpop.f32.mrb[9].mxu0  ;;  %3281 = vmatprep.subr.bf16.mxu0 %v4226_v17 }
 0x46e   : > { %v1410_v62 = vpop.f32.mrb[10].mxu0 }
 0x46f   : > { %v5090_v0 = vpack.c.bf16 %v1408_v60, %v1408_v60  ;;  %v1411_v1 = vadd.f32 %v3126_v55, %v1410_v62  ;;  %v3262_v4 = vpop.f32.mrb[11].mxu0 }
 0x471   : > { %v5094_v6 = vpack.c.bf16 %v1411_v1, %v1411_v1  ;;  %3266 = vmatmul.mubr.msk.bf16.vlgmr.msra.gmra.mrb[0].mxu1 %vm1420_vm3, %v5088_v63  ;;  %v1546_v7 = vsel %vm1544_vm4, %v5090_v0, 0 }
 0x472   : > { %3276 = vmatpush3.bf16.msra.mxu1 %v1546_v7  ;;  %3277 = vmatprep.mubr.msk.bf16.mxu1 %vm4227_vm2, %v4226_v17 }
 0x473   : > { %3272 = vmatmul.mubr.msk.bf16.vlgmr.msra.gmra.mrb[12].mxu0 %vm1420_vm3, %v5092_v5  ;;  %v1592_v8 = vsel %vm1544_vm4, %v5094_v6, 0  ;;  %3287 = vmatprep.subr.bf16.mxu1 %v4226_v17 }
 0x474   : > { %3282 = vmatpush3.bf16.msra.mxu0 %v1592_v8  ;;  %3283 = vmatprep.mubr.msk.bf16.mxu0 %vm4227_vm2, %v4226_v17 }
 0x475   : > { %3293 = vmatprep.subr.bf16.mxu0 %v4226_v17 }
 0x544   : > { %v1461_v9 = vpop.f32.mrb[0].mxu1 }
 0x545   : > { %v1513_v11 = vmul.f32 0.35355338, %v1461_v9  ;;  %v3267_v12 = vpop.f32.mrb[1].mxu1 }
 0x546   : > { %v1464_v13 = vpop.f32.mrb[2].mxu1  ;;  %v1507_v14 = vpop.f32.mrb[12].mxu0 }
 0x547   : > { %v1514_v15 = vmul.f32 0.35355338, %v1507_v14  ;;  %v3268_v16 = vpop.f32.mrb[3].mxu1  ;;  %v3273_v18 = vpop.f32.mrb[13].mxu0  ;;  %v1515_v19 = vadd.f32 %v1513_v11, %v5110_v10 }
 0x548   : > { %v1510_v20 = vpop.f32.mrb[14].mxu0 }
 0x549   : > { %v3274_v21 = vpop.f32.mrb[15].mxu0  ;;  %v1517_v22 = vsel %vm1420_vm3, %v1515_v19, -inf  ;;  %v1516_v23 = vadd.f32 %v1514_v15, %v5110_v10 }
 0x54a   : > { %1518 = vmax.xlane.f32.xlu0 %v1517_v22 }
 0x54b   : > { %v1520_v24 = vsel %vm1420_vm3, %v1516_v23, -inf }
 0x54c   : > { %1521 = vmax.xlane.f32.xlu1 %v1520_v24 }
 0x55d   : > { %1692 = vrot.lane.b32.xlu1 %v5078_v53, %s4228_s18 }
 0x5d7   : > { %v1519_v25 = vpop.xlane.xlu0 %1518 }
 0x5d8   : > { %v1523_v26 = vsub.f32 %v1515_v19, %v1519_v25 }
 0x5d9   : > { %v1522_v27 = vpop.xlane.xlu1 %1521 }
 0x5da   : > { %v1525_v28 = vmul.f32 1.442695, %v1523_v26  ;;  %v1524_v29 = vsub.f32 %v1516_v23, %v1522_v27 }
 0x5dc   : > { %3538 = vpow2.f32 %v1525_v28  ;;  %v1527_v30 = vmul.f32 1.442695, %v1524_v29 }
 0x5dd   : > { %v1693_v35 = vpop.permute.xlu1 %1692 }
 0x5de   : > { %3540 = vpow2.f32 %v1527_v30  ;;  %v1698_v46 = vsel %vm1420_vm3, %v1693_v35, 0 }
 0x5e6   : > { %v3539_v31 = vpop.eup %3538 }
 0x5e7   : > { %v1529_v32 = vsel %vm1420_vm3, %v3539_v31, 0.0 }
 0x5e8   : > { %v3541_v33 = vpop.eup %3540  ;;  %1530 = vadd.xlane.f32.xlu0 %v1529_v32 }
 0x5e9   : > { %v1532_v34 = vsel %vm1420_vm3, %v3541_v33, 0.0 }
 0x5ea   : > { %1533 = vadd.xlane.f32.xlu1 %v1532_v34 }
 0x5fb   : > { %1637 = vrot.lane.b32.xlu1 %v5088_v63, %s4228_s18 }
 0x5fe   : > { %1640 = vrot.lane.b32.xlu0 %v5074_v49, %s4228_s18 }
 0x5ff   : > { %1689 = vrot.lane.b32.xlu1 %v5092_v5, %s4228_s18 }
 0x675   : > { %v1531_v36 = vpop.xlane.xlu0 %1530 }
 0x676   : > { %3542 = vrcp.f32 %v1531_v36 }
 0x677   : > { %v1534_v37 = vpop.xlane.xlu1 %1533 }
 0x678   : > { %3544 = vrcp.f32 %v1534_v37 }
 0x679   : > { %v1641_v41 = vpop.permute.xlu0 %1640 }
 0x67a   : > { %v1646_v44 = vsel %vm1420_vm3, %v1641_v41, 0 }
 0x67b   : > { %v1638_v47 = vpop.permute.xlu1 %1637 }
 0x67f   : > { %v1690_v48 = vpop.permute.xlu1 %1689 }
 0x680   : > { %v3543_v38 = vpop.eup %3542 }
 0x681   : > { %v1537_v39 = vmul.f32 %v3543_v38, %v3539_v31 }
 0x682   : > { %v3545_v40 = vpop.eup %3544 }
 0x683   : > { %v1538_v42 = vmul.f32 %v3545_v40, %v3541_v33  ;;  %v1539_v43 = vpack.c.bf16 %v1537_v39, %v1537_v39 }
 0x685   : > { %3278 = vmatmul.mubr.msk.bf16.vlgmr.msra.gmra.mrb[4].mxu1 %vm1420_vm3, %v1539_v43  ;;  %v1540_v45 = vpack.c.bf16 %v1538_v42, %v1538_v42 }
 0x686   : > { %3288 = vmatpush3.bf16.xpose.msra.mxu1 %v1646_v44  ;;  %3289 = vmatprep.mubr.msk.bf16.mxu1 %vm4227_vm2, %v4226_v17 }
 0x687   : > { %3284 = vmatmul.mubr.msk.bf16.vlgmr.msra.gmra.mrb[16].mxu0 %vm1420_vm3, %v1540_v45  ;;  %3299 = vmatprep.subr.bf16.mxu1 %v4226_v17 }
 0x688   : > { %3294 = vmatpush3.bf16.xpose.msra.mxu0 %v1698_v46  ;;  %3295 = vmatprep.mubr.msk.bf16.mxu0 %vm4227_vm2, %v4226_v17 }
 0x689   : > { %3305 = vmatprep.subr.bf16.mxu0 %v4226_v17 }
 0x68d   : > { %3290 = vmatmul.mubr.msk.bf16.vlgmr.msra.gmra.mrb[8].mxu1 %vm1420_vm3, %v1638_v47 }
 0x68e   : > { %3301 = vmatprep.mubr.msk.bf16.mxu1 %vm4227_vm2, %v4226_v17 }
 0x68f   : > { %3296 = vmatmul.mubr.msk.bf16.vlgmr.msra.gmra.mrb[20].mxu0 %vm1420_vm3, %v1690_v48 }
 0x690   : > { %3307 = vmatprep.mubr.msk.bf16.mxu0 %vm4227_vm2, %v4226_v17 }
 0x758   : > { %v1582_v50 = vpop.f32.mrb[4].mxu1 }
 0x759   : > { %1634 = vst.msk [vmem:[#allocation3] sm:$0xff] %vm1420_vm3, %v1582_v50  ;;  %v3279_v51 = vpop.f32.mrb[5].mxu1 }
 0x75a   : > { %v1585_v52 = vpop.f32.mrb[6].mxu1  ;;  %v1628_v54 = vpop.f32.mrb[16].mxu0 }
 0x75b   : > { %1635 = vst.msk [vmem:[#allocation3 + $0x8] sm:$0xff] %vm1420_vm3, %v1628_v54  ;;  %v3280_v55 = vpop.f32.mrb[7].mxu1  ;;  %v3285_v56 = vpop.f32.mrb[17].mxu0 }
 0x75c   : > { %v1631_v57 = vpop.f32.mrb[18].mxu0 }
 0x75d   : > { %v3286_v58 = vpop.f32.mrb[19].mxu0 }
 0x760   : > { %v1682_v59 = vpop.f32.mrb[8].mxu1 }
 0x761   : > { %v1740_v60 = vmul.f32 0.35355338, %v1682_v59  ;;  %v3291_v61 = vpop.f32.mrb[9].mxu1 }
 0x762   : > { %v1685_v62 = vpop.f32.mrb[10].mxu1  ;;  %v1734_v1 = vpop.f32.mrb[20].mxu0 }
 0x763   : > { %v1741_v4 = vmul.f32 0.35355338, %v1734_v1  ;;  %v3292_v7 = vpop.f32.mrb[11].mxu1  ;;  %v3297_v8 = vpop.f32.mrb[21].mxu0  ;;  %v1742_v9 = vadd.f32 %v1740_v60, %v5110_v10 }
 0x764   : > { %v1737_v11 = vpop.f32.mrb[22].mxu0 }
 0x765   : > { %v3298_v12 = vpop.f32.mrb[23].mxu0  ;;  %v1744_v13 = vsel %vm1420_vm3, %v1742_v9, -inf  ;;  %v1743_v14 = vadd.f32 %v1741_v4, %v5110_v10 }
 0x766   : > { %1745 = vmax.xlane.f32.xlu0 %v1744_v13 }
 0x767   : > { %v1747_v15 = vsel %vm1420_vm3, %v1743_v14, -inf }
 0x768   : > { %1748 = vmax.xlane.f32.xlu1 %v1747_v15 }
 0x779   : > { %1818 = vrot.lane.b32.xlu1 %v5094_v6, %s4228_s18 }
 0x77d   : > { %1879 = vrot.lane.b32.xlu1 %v5074_v49, %s4229_s28 }
 0x781   : > { %1929 = vrot.lane.b32.xlu1 %v5078_v53, %s4229_s28 }
 0x785   : > { %1927 = vrot.lane.b32.xlu1 %v5092_v5, %s4229_s28 }
 0x7f3   : > { %v1746_v16 = vpop.xlane.xlu0 %1745 }
 0x7f4   : > { %v1750_v18 = vsub.f32 %v1742_v9, %v1746_v16 }
 0x7f5   : > { %v1749_v19 = vpop.xlane.xlu1 %1748 }
 0x7f6   : > { %v1752_v20 = vmul.f32 1.442695, %v1750_v18  ;;  %v1751_v21 = vsub.f32 %v1743_v14, %v1749_v19 }
 0x7f8   : > { %3546 = vpow2.f32 %v1752_v20  ;;  %v1754_v22 = vmul.f32 1.442695, %v1751_v21 }
 0x7f9   : > { %v1819_v23 = vpop.permute.xlu1 %1818 }
 0x7fa   : > { %3548 = vpow2.f32 %v1754_v22  ;;  %v1824_v24 = vsel %vm1544_vm4, %v1819_v23, 0 }
 0x7fb   : > { %3306 = vmatpush3.bf16.msra.mxu0 %v1824_v24 }
 0x7fc   : > { %3317 = vmatprep.subr.bf16.mxu0 %v4226_v17 }
 0x7fd   : > { %v1880_v34 = vpop.permute.xlu1 %1879 }
 0x7fe   : > { %v1885_v40 = vsel %vm1420_vm3, %v1880_v34, 0 }
 0x801   : > { %v1930_v39 = vpop.permute.xlu1 %1929 }
 0x802   : > { %v3547_v25 = vpop.eup %3546  ;;  %v1935_v42 = vsel %vm1420_vm3, %v1930_v39, 0 }
 0x803   : > { %v1756_v26 = vsel %vm1420_vm3, %v3547_v25, 0.0 }
 0x804   : > { %v3549_v27 = vpop.eup %3548  ;;  %1757 = vadd.xlane.f32.xlu0 %v1756_v26 }
 0x805   : > { %v1759_v28 = vsel %vm1420_vm3, %v3549_v27, 0.0  ;;  %v1928_v44 = vpop.permute.xlu1 %1927 }
 0x808   : > { %1760 = vadd.xlane.f32.xlu0 %v1759_v28 }
 0x81e   : > { %1769 = vrot.lane.b32.xlu0 %v5090_v0, %s4228_s18 }
 0x822   : > { %1877 = vrot.lane.b32.xlu0 %v5088_v63, %s4229_s28 }
 0x891   : > { %v1758_v29 = vpop.xlane.xlu0 %1757 }
 0x892   : > { %3550 = vrcp.f32 %v1758_v29 }
 0x895   : > { %v1761_v30 = vpop.xlane.xlu0 %1760 }
 0x896   : > { %3552 = vrcp.f32 %v1761_v30 }
 0x899   : > { %v1770_v31 = vpop.permute.xlu0 %1769 }
 0x89a   : > { %v1775_v32 = vsel %vm1544_vm4, %v1770_v31, 0 }
 0x89b   : > { %3300 = vmatpush3.bf16.msra.mxu1 %v1775_v32 }
 0x89c   : > { %v3551_v33 = vpop.eup %3550  ;;  %3311 = vmatprep.subr.bf16.mxu1 %v4226_v17 }
 0x89d   : > { %v1764_v35 = vmul.f32 %v3551_v33, %v3547_v25  ;;  %v1878_v43 = vpop.permute.xlu0 %1877 }
 0x89f   : > { %v1766_v36 = vpack.c.bf16 %v1764_v35, %v1764_v35 }
 0x8a0   : > { %v3553_v37 = vpop.eup %3552 }
 0x8a1   : > { %v1765_v38 = vmul.f32 %v3553_v37, %v3549_v27  ;;  %3302 = vmatmul.mubr.msk.bf16.vlgmr.msra.gmra.mrb[12].mxu1 %vm1420_vm3, %v1766_v36 }
 0x8a2   : > { %3313 = vmatprep.mubr.msk.bf16.mxu1 %vm4227_vm2, %v4226_v17 }
 0x8a3   : > { %v1767_v41 = vpack.c.bf16 %v1765_v38, %v1765_v38 }
 0x8a4   : > { %3312 = vmatpush3.bf16.xpose.msra.mxu1 %v1885_v40 }
 0x8a5   : > { %3308 = vmatmul.mubr.msk.bf16.vlgmr.msra.gmra.mrb[24].mxu0 %vm1420_vm3, %v1767_v41  ;;  %3323 = vmatprep.subr.bf16.mxu1 %v4226_v17 }
 0x8a6   : > { %3318 = vmatpush3.bf16.xpose.msra.mxu0 %v1935_v42  ;;  %3319 = vmatprep.mubr.msk.bf16.mxu0 %vm4227_vm2, %v4226_v17 }
 0x8a7   : > { %3329 = vmatprep.subr.bf16.mxu0 %v4226_v17 }
 0x8ab   : > { %3314 = vmatmul.mubr.msk.bf16.vlgmr.msra.gmra.mrb[16].mxu1 %vm1420_vm3, %v1878_v43 }
 0x8ac   : > { %3325 = vmatprep.mubr.msk.bf16.mxu1 %vm4227_vm2, %v4226_v17 }
 0x8ad   : > { %3320 = vmatmul.mubr.msk.bf16.vlgmr.msra.gmra.mrb[28].mxu0 %vm1420_vm3, %v1928_v44 }
 0x8ae   : > { %3331 = vmatprep.mubr.msk.bf16.mxu0 %vm4227_vm2, %v4226_v17 }
 0x974   : > { %v5182_v45 = vpop.f32.mrb[12].mxu1 }
 0x975   : > { %v3303_v46 = vpop.f32.mrb[13].mxu1 }
 0x976   : > { %v1814_v47 = vpop.f32.mrb[14].mxu1 }
 0x977   : > { %v3304_v48 = vpop.f32.mrb[15].mxu1 }
 0x978   : > { %v5184_v50 = vpop.f32.mrb[24].mxu0 }
 0x979   : > { %v3309_v51 = vpop.f32.mrb[25].mxu0 }
 0x97a   : > { %v1863_v52 = vpop.f32.mrb[26].mxu0 }
 0x97b   : > { %v3310_v54 = vpop.f32.mrb[27].mxu0 }
 0x97e   : > { %v1921_v55 = vpop.f32.mrb[16].mxu1 }
 0x97f   : > { %v1977_v56 = vmul.f32 0.35355338, %v1921_v55  ;;  %v3315_v57 = vpop.f32.mrb[17].mxu1 }
 0x980   : > { %v1924_v58 = vpop.f32.mrb[18].mxu1  ;;  %v1971_v59 = vpop.f32.mrb[28].mxu0 }
 0x981   : > { %v1978_v60 = vmul.f32 0.35355338, %v1971_v59  ;;  %v3316_v61 = vpop.f32.mrb[19].mxu1  ;;  %v3321_v62 = vpop.f32.mrb[29].mxu0  ;;  %v1979_v1 = vadd.f32 %v1977_v56, %v5110_v10 }
 0x982   : > { %v1974_v4 = vpop.f32.mrb[30].mxu0 }
 0x983   : > { %v3322_v7 = vpop.f32.mrb[31].mxu0  ;;  %v1981_v8 = vsel %vm1420_vm3, %v1979_v1, -inf  ;;  %v1980_v9 = vadd.f32 %v1978_v60, %v5110_v10 }
 0x984   : > { %1982 = vmax.xlane.f32.xlu0 %v1981_v8 }
 0x985   : > { %v1984_v11 = vsel %vm1420_vm3, %v1980_v9, -inf }
 0x986   : > { %1985 = vmax.xlane.f32.xlu1 %v1984_v11 }
 0x997   : > { %2053 = vrot.lane.b32.xlu1 %v5094_v6, %s4229_s28 }
 0x99b   : > { %2114 = vrot.lane.b32.xlu1 %v5074_v49, %s4230_s14 }
 0x99f   : > { %2164 = vrot.lane.b32.xlu1 %v5078_v53, %s4230_s14 }
 0x9a3   : > { %2162 = vrot.lane.b32.xlu1 %v5092_v5, %s4230_s14 }
 0xa11   : > { %v1983_v12 = vpop.xlane.xlu0 %1982 }
 0xa12   : > { %v1987_v13 = vsub.f32 %v1979_v1, %v1983_v12 }
 0xa13   : > { %v1986_v14 = vpop.xlane.xlu1 %1985 }
 0xa14   : > { %v1989_v15 = vmul.f32 1.442695, %v1987_v13  ;;  %v1988_v16 = vsub.f32 %v1980_v9, %v1986_v14 }
 0xa16   : > { %3554 = vpow2.f32 %v1989_v15  ;;  %v1991_v18 = vmul.f32 1.442695, %v1988_v16 }
 0xa17   : > { %v2054_v19 = vpop.permute.xlu1 %2053 }
 0xa18   : > { %3556 = vpow2.f32 %v1991_v18  ;;  %v2059_v20 = vsel %vm1544_vm4, %v2054_v19, 0 }
 0xa19   : > { %3330 = vmatpush3.bf16.msra.mxu0 %v2059_v20 }
 0xa1a   : > { %3341 = vmatprep.subr.bf16.mxu0 %v4226_v17 }
 0xa1b   : > { %v2115_v27 = vpop.permute.xlu1 %2114 }
 0xa1f   : > { %v2165_v32 = vpop.permute.xlu1 %2164 }
 0xa20   : > { %v3555_v49 = vpop.eup %3554  ;;  %v2170_v34 = vsel %vm1420_vm3, %v2165_v32, 0 }
 0xa21   : > { %v1993_v53 = vsel %vm1420_vm3, %v3555_v49, 0.0 }
 0xa22   : > { %v3557_v21 = vpop.eup %3556  ;;  %1994 = vadd.xlane.f32.xlu0 %v1993_v53 }
 0xa23   : > { %v1996_v5 = vsel %vm1420_vm3, %v3557_v21, 0.0  ;;  %v2163_v36 = vpop.permute.xlu1 %2162 }
 0xa26   : > { %1997 = vadd.xlane.f32.xlu0 %v1996_v5 }
 0xa3c   : > { %2005 = vrot.lane.b32.xlu0 %v5090_v0, %s4229_s28 }
 0xa40   : > { %2112 = vrot.lane.b32.xlu0 %v5088_v63, %s4230_s14  ;;  %v2120_v63 = vsel %vm1420_vm3, %v2115_v27, 0 }
 0xaaf   : > { %v1995_v22 = vpop.xlane.xlu0 %1994 }
 0xab0   : > { %3558 = vrcp.f32 %v1995_v22 }
 0xab3   : > { %v1998_v23 = vpop.xlane.xlu0 %1997 }
 0xab4   : > { %3560 = vrcp.f32 %v1998_v23 }
 0xab7   : > { %v2006_v24 = vpop.permute.xlu0 %2005 }
 0xab8   : > { %v2011_v25 = vsel %vm1544_vm4, %v2006_v24, 0 }
 0xab9   : > { %3324 = vmatpush3.bf16.msra.mxu1 %v2011_v25  ;;  %v3522_v25 = vld [vmem:[%s5465_s20] sm:$0xff]  }
 0xaba   : > { %v3559_v26 = vpop.eup %3558  ;;  %3335 = vmatprep.subr.bf16.mxu1 %v4226_v17 }
 0xabb   : > { %v2001_v28 = vmul.f32 %v3559_v26, %v3555_v49  ;;  %v2113_v35 = vpop.permute.xlu0 %2112  ;;  %v3523_v26 = vld [vmem:[%s5466_s7 + $0x8] sm:$0xff]  }
 0xabd   : > { %v2003_v29 = vpack.c.bf16 %v2001_v28, %v2001_v28 }
 0xabe   : > { %v3561_v30 = vpop.eup %3560 }
 0xabf   : > { %v2002_v31 = vmul.f32 %v3561_v30, %v3557_v21  ;;  %3326 = vmatmul.mubr.msk.bf16.vlgmr.msra.gmra.mrb[20].mxu1 %vm1420_vm3, %v2003_v29 }
 0xac0   : > { %3337 = vmatprep.mubr.msk.bf16.mxu1 %vm4227_vm2, %v4226_v17 }
 0xac1   : > { %v2004_v33 = vpack.c.bf16 %v2002_v31, %v2002_v31 }
 0xac2   : > { %3336 = vmatpush3.bf16.xpose.msra.mxu1 %v2120_v63 }
 0xac3   : > { %3332 = vmatmul.mubr.msk.bf16.vlgmr.msra.gmra.mrb[32].mxu0 %vm1420_vm3, %v2004_v33  ;;  %3347 = vmatprep.subr.bf16.mxu1 %v4226_v17 }
 0xac4   : > { %3342 = vmatpush3.bf16.xpose.msra.mxu0 %v2170_v34  ;;  %3343 = vmatprep.mubr.msk.bf16.mxu0 %vm4227_vm2, %v4226_v17 }
 0xac5   : > { %3353 = vmatprep.subr.bf16.mxu0 %v4226_v17 }
 0xac9   : > { %3338 = vmatmul.mubr.msk.bf16.vlgmr.msra.gmra.mrb[24].mxu1 %vm1420_vm3, %v2113_v35 }
 0xaca   : > { %3349 = vmatprep.mubr.msk.bf16.mxu1 %vm4227_vm2, %v4226_v17 }
 0xacb   : > { %3344 = vmatmul.mubr.msk.bf16.vlgmr.msra.gmra.mrb[36].mxu0 %vm1420_vm3, %v2163_v36 }
 0xacc   : > { %3355 = vmatprep.mubr.msk.bf16.mxu0 %vm4227_vm2, %v4226_v17 }
 0xb92   : > { %v2047_v37 = vpop.f32.mrb[20].mxu1 }
 0xb93   : > { %v3327_v38 = vpop.f32.mrb[21].mxu1 }
 0xb94   : > { %v2050_v39 = vpop.f32.mrb[22].mxu1 }
 0xb95   : > { %v3328_v40 = vpop.f32.mrb[23].mxu1  ;;  %v3146_v39 = vld [vmem:[%s5467_s5] ss:$0 sm:$0xff] }
 0xb96   : > { %v2095_v41 = vpop.f32.mrb[32].mxu0 }
 0xb97   : > { %v3333_v42 = vpop.f32.mrb[33].mxu0 }
 0xb98   : > { %v2098_v43 = vpop.f32.mrb[34].mxu0 }
 0xb99   : > { %v3334_v44 = vpop.f32.mrb[35].mxu0 }
 0xb9c   : > { %v2156_v46 = vpop.f32.mrb[24].mxu1 }
 0xb9d   : > { %v2212_v47 = vmul.f32 0.35355338, %v2156_v46  ;;  %v3339_v48 = vpop.f32.mrb[25].mxu1 }
 0xb9e   : > { %v2159_v51 = vpop.f32.mrb[26].mxu1  ;;  %v2206_v52 = vpop.f32.mrb[36].mxu0 }
 0xb9f   : > { %v2213_v54 = vmul.f32 0.35355338, %v2206_v52  ;;  %v3340_v55 = vpop.f32.mrb[27].mxu1  ;;  %v3345_v56 = vpop.f32.mrb[37].mxu0  ;;  %v2214_v57 = vadd.f32 %v2212_v47, %v5110_v10 }
 0xba0   : > { %v2209_v58 = vpop.f32.mrb[38].mxu0 }
 0xba1   : > { %v3346_v59 = vpop.f32.mrb[39].mxu0  ;;  %v2216_v60 = vsel %vm1420_vm3, %v2214_v57, -inf  ;;  %v2215_v61 = vadd.f32 %v2213_v54, %v5110_v10 }
 0xba2   : > { %2217 = vmax.xlane.f32.xlu0 %v2216_v60 }
 0xba3   : > { %v2219_v62 = vsel %vm1420_vm3, %v2215_v61, -inf }
 0xba4   : > { %2220 = vmax.xlane.f32.xlu1 %v2219_v62  ;;  %v3524_v62 = vld [vmem:[%s1009_s16] sm:$0xff]  }
 0xbb5   : > { %2288 = vrot.lane.b32.xlu1 %v5094_v6, %s4230_s14 }
 0xbb9   : > { %1868 = vrot.lane.b32.xlu1 %v5182_v45, %s4231_s3 }
 0xbbd   : > { %1870 = vrot.lane.b32.xlu1 %v5184_v50, %s4231_s3 }
 0xbc1   : > { %2105 = vrot.lane.b32.xlu1 %v2095_v41, %s4232_s1 }
 0xc2f   : > { %v2218_v1 = vpop.xlane.xlu0 %2217 }
 0xc30   : > { %v2222_v4 = vsub.f32 %v2214_v57, %v2218_v1  ;;  %v3525_v1 = vld [vmem:[%s1009_s16 + $0x8] sm:$0xff]  }
 0xc31   : > { %v2221_v7 = vpop.xlane.xlu1 %2220 }
 0xc32   : > { %v2224_v10 = vmul.f32 1.442695, %v2222_v4  ;;  %v2223_v8 = vsub.f32 %v2215_v61, %v2221_v7 }
 0xc34   : > { %3562 = vpow2.f32 %v2224_v10  ;;  %v2226_v9 = vmul.f32 1.442695, %v2223_v8 }
 0xc35   : > { %v2289_v11 = vpop.permute.xlu1 %2288 }
 0xc36   : > { %3564 = vpow2.f32 %v2226_v9  ;;  %v2294_v6 = vsel %vm1544_vm4, %v2289_v11, 0 }
 0xc37   : > { %3354 = vmatpush3.bf16.msra.mxu0 %v2294_v6 }
 0xc38   : > { %3367 = vmatprep.subr.bf16.mxu0 %v4226_v17 }
 0xc39   : > { %v1869_v45 = vpop.permute.xlu1 %1868 }
 0xc3a   : > { %1875 = vst.msk [vmem:[#allocation3] sm:$0xff] %vm1874_vm5, %v1869_v45 }
 0xc3d   : > { %v1871_v50 = vpop.permute.xlu1 %1870 }
 0xc3e   : > { %v3563_v12 = vpop.eup %3562  ;;  %1876 = vst.msk [vmem:[#allocation3 + $0x8] sm:$0xff] %vm1874_vm5, %v1871_v50  ;;  %v3151_v50 = vld [vmem:[%s5468_s2] ss:$0 sm:$0xff] }
 0xc3f   : > { %v2228_v13 = vsel %vm1420_vm3, %v3563_v12, 0.0 }
 0xc40   : > { %v3565_v14 = vpop.eup %3564  ;;  %2229 = vadd.xlane.f32.xlu0 %v2228_v13 }
 0xc41   : > { %v2106_v15 = vpop.permute.xlu1 %2105  ;;  %v2231_v16 = vsel %vm1420_vm3, %v3565_v14, 0.0 }
 0xc42   : > { %2111 = vst.msk [vmem:[#allocation3 + $0x8] sm:$0xff] %vm2109_vm6, %v2106_v15  ;;  %v3152_v15 = vld [vmem:[%s5469_s25] ss:$0 sm:$0xff] }
 0xc44   : > { %2232 = vadd.xlane.f32.xlu0 %v2231_v16 }
 0xc5a   : > { %2240 = vrot.lane.b32.xlu0 %v5090_v0, %s4230_s14 }
 0xc5e   : > { %2103 = vrot.lane.b32.xlu0 %v2047_v37, %s4232_s1 }
 0xccd   : > { %v2230_v18 = vpop.xlane.xlu0 %2229 }
 0xcce   : > { %3566 = vrcp.f32 %v2230_v18 }
 0xcd1   : > { %v2233_v19 = vpop.xlane.xlu0 %2232 }
 0xcd2   : > { %3568 = vrcp.f32 %v2233_v19 }
 0xcd5   : > { %v2241_v20 = vpop.permute.xlu0 %2240 }
 0xcd6   : > { %v2246_v49 = vsel %vm1544_vm4, %v2241_v20, 0 }
 0xcd7   : > { %3348 = vmatpush3.bf16.msra.mxu1 %v2246_v49  ;;  %v3526_v49 = vld [vmem:[%s5011_s21] sm:$0xff]  }
 0xcd8   : > { %v3567_v53 = vpop.eup %3566  ;;  %3359 = vmatprep.subr.bf16.mxu1 %v4226_v17 }
 0xcd9   : > { %v2236_v21 = vmul.f32 %v3567_v53, %v3563_v12  ;;  %v2104_v5 = vpop.permute.xlu0 %2103  ;;  %v3527_v53 = vld [vmem:[%s5011_s21 + $0x8] sm:$0xff]  }
 0xcda   : > { %2110 = vst.msk [vmem:[#allocation3] sm:$0xff] %vm2109_vm6, %v2104_v5  ;;  %v3529_v5 = vld [vmem:[%s5011_s21 + $0x18] sm:$0xff]  }
 0xcdb   : > { %v2238_v22 = vpack.c.bf16 %v2236_v21, %v2236_v21  ;;  %v3528_v21 = vld [vmem:[%s5011_s21 + $0x10] sm:$0xff]  }
 0xcdc   : > { %v3569_v0 = vpop.eup %3568 }
 0xcdd   : > { %v2237_v23 = vmul.f32 %v3569_v0, %v3565_v14  ;;  %3350 = vmatmul.mubr.msk.bf16.vlgmr.msra.gmra.mrb[28].mxu1 %vm1420_vm3, %v2238_v22  ;;  %v3530_v22 = vld [vmem:[%s5011_s21 + $0x20] sm:$0xff]   ;;  %v3531_v0 = vld [vmem:[%s5011_s21 + $0x28] sm:$0xff]  }
 0xcde   : > { %3363 = vmatprep.mubr.msk.bf16.mxu1 %vm4227_vm2, %v4226_v17  ;;  %3360 = vmatpush3.bf16.msra.mxu1 %v3522_v25  ;;  %v3153_v25 = vld [vmem:[%s1017_s27] ss:$0 sm:$0xff]  ;;  %s5470_s27 = sld [smem:[#allocation46_spill]] }
 0xcdf   : > { %v2239_v24 = vpack.c.bf16 %v2237_v23, %v2237_v23  ;;  %3361 = vmatprep.subr.bf16.mxu1 %v4226_v17  ;;  %v3532_v23 = vld [vmem:[%s5011_s21 + $0x30] sm:$0xff]  }
 0xce1   : > { %3356 = vmatmul.mubr.msk.bf16.vlgmr.msra.gmra.mrb[40].mxu0 %vm1420_vm3, %v2239_v24  ;;  %v3533_v24 = vld [vmem:[%s5011_s21 + $0x38] sm:$0xff]  }
 0xce2   : > { %3371 = vmatprep.mubr.msk.bf16.mxu0 %vm4227_vm2, %v4226_v17  ;;  %3362 = vmatpush3.bf16.msra.mxu1 %v3523_v26 }
 0xce3   : > { %3375 = vmatprep.subr.bf16.mxu1 %v4226_v17  ;;  %3368 = vmatpush3.bf16.msra.mxu0 %v3524_v62 }
 0xce4   : > { %3369 = vmatprep.subr.bf16.mxu0 %v4226_v17  ;;  %p3169_p1 = scmp.ne.s32.totalorder %s5470_s27, 1 }
 0xce7   : > { %3370 = vmatpush3.bf16.msra.mxu0 %v3525_v1 }
 0xdb0   : > { %v2282_v27 = vpop.f32.mrb[28].mxu1 }
 0xdb1   : > { %2338 = vrot.lane.b32.xlu0 %v2282_v27, %s4233_s30  ;;  %v3351_v28 = vpop.f32.mrb[29].mxu1 }
 0xdb2   : > { %v2285_v29 = vpop.f32.mrb[30].mxu1 }
 0xdb3   : > { %v3352_v30 = vpop.f32.mrb[31].mxu1 }
 0xdb4   : > { %v2330_v31 = vpop.f32.mrb[40].mxu0 }
 0xdb5   : > { %2340 = vrot.lane.b32.xlu1 %v2330_v31, %s4233_s30  ;;  %v3357_v32 = vpop.f32.mrb[41].mxu0 }
 0xdb6   : > { %v2333_v63 = vpop.f32.mrb[42].mxu0 }
 0xdb7   : > { %v3358_v33 = vpop.f32.mrb[43].mxu0 }
 0xe23   : > { %v2339_v34 = vpop.permute.xlu0 %2338 }
 0xe24   : > { %2345 = vst.msk [vmem:[#allocation3] sm:$0xff] %vm2344_vm7, %v2339_v34 }
 0xe27   : > { %v2341_v35 = vpop.permute.xlu1 %2340 }
 0xe28   : > { %2346 = vst.msk [vmem:[#allocation3 + $0x8] sm:$0xff] %vm2344_vm7, %v2341_v35 }
 0xe2b   : > { %v2347_v36 = vld [vmem:[#allocation3] sm:$0xff] }
 0xe2f   : > { %v2348_v37 = vld [vmem:[#allocation3 + $0x8] sm:$0xff] }
 0xe30   : > { %v3181_v38 = vpack.c.bf16 %v2348_v37, %v2347_v36 }
 0xe32   : > { %3364 = vmatmul.mubr.msk.bf16.vlgmr.msra.gmra.mrb[32].mxu1 %vm1168_vm1, %v3181_v38 }
 0xe33   : > { %3391 = vmatprep.mubr.msk.bf16.mxu1 %vm4227_vm2, %v4226_v17  ;;  %3376 = vmatpush3.bf16.msra.mxu1 %v3526_v49 }
 0xe34   : > { %3377 = vmatprep.subr.bf16.mxu1 %v4226_v17 }
 0xe37   : > { %3378 = vmatpush3.bf16.msra.mxu1 %v3527_v53 }
 0xe38   : > { %3379 = vmatprep.subr.bf16.mxu1 %v4226_v17 }
 0xe3b   : > { %3380 = vmatpush3.bf16.msra.mxu1 %v3528_v21 }
 0xe3c   : > { %3381 = vmatprep.subr.bf16.mxu1 %v4226_v17 }
 0xe3f   : > { %3382 = vmatpush3.bf16.msra.mxu1 %v3529_v5 }
 0xe40   : > { %3383 = vmatprep.subr.bf16.mxu1 %v4226_v17 }
 0xe43   : > { %3384 = vmatpush3.bf16.msra.mxu1 %v3530_v22 }
 0xe44   : > { %3385 = vmatprep.subr.bf16.mxu1 %v4226_v17 }
 0xe47   : > { %3386 = vmatpush3.bf16.msra.mxu1 %v3531_v0 }
 0xe48   : > { %3387 = vmatprep.subr.bf16.mxu1 %v4226_v17 }
 0xe4b   : > { %3388 = vmatpush3.bf16.msra.mxu1 %v3532_v23 }
 0xe4c   : > { %3389 = vmatprep.subr.bf16.mxu1 %v4226_v17 }
 0xe4f   : > { %3390 = vmatpush3.bf16.msra.mxu1 %v3533_v24 }
 0xf05   : > { %v2416_v40 = vpop.f32.mrb[32].mxu1 }
 0xf06   : > { %v2417_v41 = vadd.f32 %v3146_v39, %v2416_v40  ;;  %v3365_v42 = vpop.f32.mrb[33].mxu1 }
 0xf07   : > { %v2419_v43 = vpop.f32.mrb[34].mxu1 }
 0xf08   : > { %v5262_v44 = vadd.f32 %v2417_v41, %v5023_v2  ;;  %v2420_v46 = vadd.f32 %v3146_v39, %v2419_v43  ;;  %v3366_v47 = vpop.f32.mrb[35].mxu1  ;;  %v3160_v43 = vld [vmem:[%s1034_s12] ss:$0 sm:$0xff] }
 0xf0a   : > { %v5265_v48 = vadd.f32 %v2420_v46, %v5025_v3  ;;  %v2427_v51 = vsel %vm1168_vm1, %v5262_v44, 0.0 }
 0xf0b   : > { %2428 = vadd.xlane.f32.xlu0 %v2427_v51 }
 0xf0c   : > { %v2430_v52 = vsel %vm1168_vm1, %v5265_v48, 0.0 }
 0xf0d   : > { %2431 = vadd.xlane.f32.xlu1 %v2430_v52 }
 0xf98   : > { %v2429_v54 = vpop.xlane.xlu0 %2428 }
 0xf99   : > { %v2433_v55 = vmul.f32 0.03125, %v2429_v54 }
 0xf9a   : > { %v2432_v56 = vpop.xlane.xlu1 %2431 }
 0xf9b   : > { %v2435_v2 = vsub.f32 %v5262_v44, %v2433_v55  ;;  %v2434_v57 = vmul.f32 0.03125, %v2432_v56 }
 0xf9d   : > { %v2436_v58 = vsub.f32 %v5265_v48, %v2434_v57  ;;  %v2437_v3 = vmul.f32 %v2435_v2, %v2435_v2 }
 0xf9f   : > { %v2439_v59 = vsel %vm1168_vm1, %v2437_v3, 0.0  ;;  %v2438_v60 = vmul.f32 %v2436_v58, %v2436_v58 }
 0xfa0   : > { %2440 = vadd.xlane.f32.xlu0 %v2439_v59 }
 0xfa1   : > { %v2442_v61 = vsel %vm1168_vm1, %v2438_v60, 0.0 }
 0xfa4   : > { %2443 = vadd.xlane.f32.xlu0 %v2442_v61 }
0x102d   : > { %v2441_v4 = vpop.xlane.xlu0 %2440 }
0x102e   : > { %v2445_v7 = vmul.f32 0.03125, %v2441_v4 }
0x1030   : > { %v2447_v10 = vadd.f32 1e-05, %v2445_v7 }
0x1031   : > { %v2444_v8 = vpop.xlane.xlu0 %2443 }
0x1032   : > { %3570 = vrsqrt.f32 %v2447_v10  ;;  %v2446_v9 = vmul.f32 0.03125, %v2444_v8 }
0x1034   : > { %v2448_v11 = vadd.f32 1e-05, %v2446_v9 }
0x1036   : > { %3572 = vrsqrt.f32 %v2448_v11 }
0x103c   : > { %v3571_v6 = vpop.eup %3570 }
0x103d   : > { %v2451_v45 = vmul.f32 %v3571_v6, %v2435_v2 }
0x103f   : > { %v2459_v13 = vmul.f32 %v3151_v50, %v2451_v45 }
0x1040   : > { %v3573_v12 = vpop.eup %3572 }
0x1041   : > { %v2452_v14 = vmul.f32 %v3573_v12, %v2436_v58  ;;  %v2467_v18 = vadd.f32 %v3152_v15, %v2459_v13 }
0x1043   : > { %v2460_v16 = vmul.f32 %v3151_v50, %v2452_v14 }
0x1045   : > { %v2468_v19 = vadd.f32 %v3152_v15, %v2460_v16 }
0x1047   : > { %v3182_v20 = vpack.c.bf16 %v2468_v19, %v2467_v18 }
0x1049   : > { %3372 = vmatmul.mubr.msk.bf16.vlgmr.msra.gmra.mrb[44].mxu0 %vm1168_vm1, %v3182_v20 }
0x111c   : > { %v2536_v26 = vpop.f32.mrb[44].mxu0 }
0x111d   : > { %v2537_v27 = vadd.f32 %v3153_v25, %v2536_v26  ;;  %v3373_v28 = vpop.f32.mrb[45].mxu0 }
0x111e   : > { %v2539_v29 = vpop.f32.mrb[46].mxu0 }
0x111f   : > { %v3158_v30 = vmul.f32 -1.702, %v2537_v27  ;;  %v2540_v31 = vadd.f32 %v3153_v25, %v2539_v29  ;;  %v3374_v32 = vpop.f32.mrb[47].mxu0 }
0x1121   : > { %v2547_v63 = vmul.f32 1.442695, %v3158_v30  ;;  %v3159_v33 = vmul.f32 -1.702, %v2540_v31 }
0x1123   : > { %3574 = vpow2.f32 %v2547_v63  ;;  %v2549_v34 = vmul.f32 1.442695, %v3159_v33 }
0x1125   : > { %3576 = vpow2.f32 %v2549_v34 }
0x112d   : > { %v3575_v35 = vpop.eup %3574 }
0x112e   : > { %v2551_v36 = vadd.f32 1.0, %v3575_v35 }
0x112f   : > { %v3577_v17 = vpop.eup %3576 }
0x1130   : > { %3578 = vrcp.f32 %v2551_v36  ;;  %v2552_v37 = vadd.f32 1.0, %v3577_v17 }
0x1132   : > { %3580 = vrcp.f32 %v2552_v37 }
0x113a   : > { %v3579_v38 = vpop.eup %3578 }
0x113b   : > { %v2557_v40 = vmul.f32 %v3579_v38, %v2537_v27 }
0x113c   : > { %v3581_v39 = vpop.eup %3580 }
0x113d   : > { %v2558_v41 = vmul.f32 %v3581_v39, %v2540_v31 }
0x113f   : > { %v2559_v42 = vpack.c.bf16 %v2558_v41, %v2557_v40 }
0x1141   : > { %3392 = vmatmul.mubr.bf16.vlgmr.msra.gmra.mrb[36].mxu1 %v2559_v42 }
0x1214   : > { %v2665_v46 = vpop.f32.mrb[36].mxu1 }
0x1215   : > { %v2666_v47 = vadd.f32 %v3160_v43, %v2665_v46  ;;  %v3393_v51 = vpop.f32.mrb[37].mxu1  ;;  %2679 = sbr.rel (%p3169_p1) target bundleno = 4644 (0x1224), region = 172 }
0x1216   : > { %v2668_v52 = vpop.f32.mrb[38].mxu1 }
0x1217   : > { %v2672_v54 = vadd.f32 %v2666_v47, %v5262_v44  ;;  %v2669_v55 = vadd.f32 %v3160_v43, %v2668_v52  ;;  %v3394_v56 = vpop.f32.mrb[39].mxu1 }
0x1219   : > { %2674 = vst.msk [vmem:[#allocation2] sm:$0xff] %vm1168_vm1, %v2672_v54  ;;  %v2673_v2 = vadd.f32 %v2669_v55, %v5265_v48 }
0x121b   : > { %2675 = vst.msk [vmem:[#allocation2 + $0x8] sm:$0xff] %vm1168_vm1, %v2673_v2 }
0x1220   : > { %v2680_v57 = vld [vmem:[#allocation2] sm:$0xff] }
0x1221   : > { %2682 = vst.msk [vmem:[#allocation33] sm:$0xff] %vm1168_vm1, %v2680_v57 }
0x1222   : > { %v2681_v58 = vld [vmem:[#allocation2 + $0x8] sm:$0xff] }
0x1223   : > { %2683 = vst.msk [vmem:[#allocation33 + $0x8] sm:$0xff] %vm1168_vm1, %v2681_v58 }
0x1224 PF: > { %s5471_s22 = sld [smem:[#allocation47_spill]]  ;;  %s4234_s16 = smov [#allocation33]  }
0x1225   : > { %s2693_s12 = sshll.u32 %s4234_s16, 4  ;;  %s2694_s12 = int_to_ptr.vmem [resolvable:$true] %s2693_s12 }
0x1226   : > { %s4086_s21 = scalar_lea.vmem %s2694_s12, 256  ;;  %p4093_p4 = scmp.lt.s32.totalorder %s2694_s12, %s2694_s12 }
0x1227   : > { %p4087_p5 = scmp.ne.s32.totalorder %s2694_s12, %s4086_s21  ;;  %p4094_p6 = scmp.lt.s32.totalorder %s4086_s21, %s4086_s21 }
0x1229   : > { %p4095_p7 = por %p4094_p6, %p4093_p4 }
0x122a   : > { %p3450_p8 = scmp.eq.s32.totalorder %s5471_s22, 1 }
0x122c   : > { %p4088_p2 = pnand %p4087_p5, %p3450_p8 }
0x122e   : > { %p4089_p10 = pneg %p4088_p2 }
0x1230   : > { %p4096_p9 = pnand %p4095_p7, %p4089_p10 }
0x1232   : > { %4099 = shalt.err (!%p4096_p9)
}
0x1233   : > { %s5472_s14 = sld [smem:[#allocation62_spill]] }
0x1239   : > { %s4100_s1 = scalar_lea.hbm %s5472_s14, 256 }
0x123a   : > { %p4101_p12 = scmp.ne.s32.totalorder %s5472_s14, %s4100_s1  ;;  %p4106_p11 = scmp.lt.u32.totalorder %s4100_s1, %s5472_s14 }
0x123c   : > { %p4102_p0 = pnand %p4101_p12, %p3450_p8 }
0x123e   : > { %p4103_p3 = pneg %p4102_p0 }
0x1240   : > { %p4108_p13 = pnand %p4106_p11, %p4103_p3 }
0x1242   : > { %4111 = shalt.err (!%p4108_p13)
}
0x1243   : > { %s4235_s2 = smov 128  }
0x1244   : > { %3436 = dma.vmem_to_hbm [thread:$0]  (%p3450_p8), %s2694_s12, 256, %s5472_s14, [#allocation6], %s4235_s2, %s4235_s2, %s4231_s3  }
0x1245   : > { %4177 = dma.done.wait (%p3450_p8), [#allocation6], 256  }
0x1246   : > { %4179 = vsyncadd (%p3450_p8), [#allocation6], 4294967040 }
0x1247 PF: > { %s55_s19 = sadd.s32 1, %s4202_s19   ;;  %s5473_s27 = sld [smem:[#allocation45_spill]] }
0x1248   : > { %p52_p1 = scmp.ge.s32.totalorder %s55_s19, 4   ;;  %s5474_s16 = sld [smem:[#allocation50_spill]] }
0x1249   : > { %s5475_s21 = sld [smem:[#allocation48_spill]]  ;;  %s5476_s28 = smov %s4190_s29 }
0x124a   : > { %s5478_s30 = smov %s4198_s0  ;;  %54 = sbr.rel (!%p52_p1) target bundleno = 33 (0x21), region = 327 }
0x124e   : > { %s5477_s29 = smov %s5474_s16 }
0x124f   : > { %s5479_s0 = smov %s5475_s21 }
0x1251   :  { %2709 = vsyncpa [#allocation5], 1 }
0x1252   :  { %2711 = vsyncpa [#allocation5 + $0x1], 1 }
0x1253   :  { %2712 = vsyncpa [#allocation8], 1 }
0x1254   :  { %2714 = vsyncpa [#allocation8 + $0x1], 1 }
0x1255   :  { %2715 = vsyncpa [#allocation11], 1 }
0x1256   :  { %2717 = vsyncpa [#allocation11 + $0x1], 1 }
0x1257   :  { %2718 = vsyncpa [#allocation14], 1 }
0x1258   :  { %2720 = vsyncpa [#allocation14 + $0x1], 1 }
0x1259   :  { %2721 = vsyncpa [#allocation17], 1 }
0x125a   :  { %2723 = vsyncpa [#allocation17 + $0x1], 1 }
0x125b   :  { %2724 = vsyncpa [#allocation20], 1 }
0x125c   :  { %2726 = vsyncpa [#allocation20 + $0x1], 1 }
0x125d   :  { %2727 = vsyncpa [#allocation23], 1 }
0x125e   :  { %2729 = vsyncpa [#allocation23 + $0x1], 1 }
0x125f   :  { %2730 = vsyncpa [#allocation26], 1 }
0x1260   :  { %2732 = vsyncpa [#allocation26 + $0x1], 1 }
0x1261   :  { %2733 = vsyncpa [#allocation29], 1 }
0x1262   :  { %2735 = vsyncpa [#allocation29 + $0x1], 1 }
0x1263   :  { %2736 = vsyncpa [#allocation32], 1 }
0x1264   :  { %2737 = vsyncpa [#allocation6], 1 }
0x1265   :  { %2739 = vsyncpa [#allocation6 + $0x1], 1 }

</bundles_post_ra>
